<compile_context>
chip_gen: v5e
topology: v5e:2x2
jax: 0.10.0
libtpu: 0.0.40
codegen_flags: <defaults>
</compile_context>

<pallas_src>
import functools

import jax
import jax.numpy as jnp
from jax.experimental import pallas as pl
from jax.experimental.pallas import tpu as pltpu

IN_DIM = 1024
H1_DIM = 512
H2_DIM = 256
OUT_DIM = 1


def _round_up(x, m):
    return ((x + m - 1) // m) * m


def _mlp_kernel(x_ref, w1_ref, b1_ref, w2_ref, b2_ref, w3_ref, b3_ref, o_ref):
    # f32 -> bf16 cast done in VMEM (cheap VPU work hidden under the MXU) instead
    # of a separate wrapper-side XLA pass (~2x less HBM traffic on x).
    x = x_ref[...].astype(jnp.bfloat16)
    # fc1 + ReLU: bf16 x bf16 MXU matmul, f32 accumulate; bias/ReLU stay in f32.
    h1 = jnp.dot(x, w1_ref[...], preferred_element_type=jnp.float32)
    h1 = jnp.maximum(h1 + b1_ref[...], 0.0)
    # fc2 + ReLU.
    h2 = jnp.dot(h1.astype(jnp.bfloat16), w2_ref[...],
                 preferred_element_type=jnp.float32)
    h2 = jnp.maximum(h2 + b2_ref[...], 0.0)
    # fc3 (N=1) kept off the MXU: VPU multiply against the (1, 256) w3 row,
    # fold the two aligned 128-lane halves on the VPU, then one 128-lane XLU
    # reduction (halves the per-step XLU work at large batch tiles).
    p = h2 * w3_ref[...]
    p = p[:, : H2_DIM // 2] + p[:, H2_DIM // 2:]
    logits = jnp.sum(p, axis=-1, keepdims=True) + b3_ref[...]
    o_ref[...] = jax.nn.sigmoid(logits).astype(o_ref.dtype)


def _const_spec(block_shape):
    # Grid-invariant operand: constant index_map + single pipeline buffer
    # (the second buffer is dead weight; frees ~1.3 MiB VMEM, mostly W1).
    return pl.BlockSpec(block_shape, lambda i: (0, 0),
                        pipeline_mode=pl.Buffered(1))


def _pallas_forward(x, w1, b1, w2, b2, w3_row, b3, block_b):
    B = x.shape[0]
    grid = (pl.cdiv(B, block_b),)  # partial tail block handled by Pallas clipping
    return pl.pallas_call(
        _mlp_kernel,
        out_shape=jax.ShapeDtypeStruct((B, OUT_DIM), jnp.float32),
        grid_spec=pltpu.PrefetchScalarGridSpec(
            num_scalar_prefetch=0,
            grid=grid,
            in_specs=[
                pl.BlockSpec((block_b, IN_DIM), lambda i: (i, 0)),  # x tile (f32)
                _const_spec((IN_DIM, H1_DIM)),   # W1 (bf16)
                _const_spec((1, H1_DIM)),        # b1 (f32)
                _const_spec((H1_DIM, H2_DIM)),   # W2 (bf16)
                _const_spec((1, H2_DIM)),        # b2 (f32)
                _const_spec((1, H2_DIM)),        # W3 row (f32)
                _const_spec((1, OUT_DIM)),       # b3 (f32)
            ],
            out_specs=pl.BlockSpec((block_b, OUT_DIM), lambda i: (i, 0)),
        ),
        compiler_params=pltpu.CompilerParams(
            dimension_semantics=("parallel",),   # batch axis shards across v7x TCs
            vmem_limit_bytes=48 * 1024 * 1024,   # headroom under v7x 64 MiB phys.
        ),
    )(x, w1, b1, w2, b2, w3_row, b3)


def _choose_block(B, block_b):
    """Batch tile: multiple of 8, <= block_b, and >= 2 grid steps when possible."""
    blk = min(block_b, _round_up(B, 8))
    blk = max(8, (blk // 8) * 8)
    if blk >= B and B > 8:
        # Split the batch so the single "parallel" grid axis has >= 2 steps
        # (keeps both v7x TensorCores busy and lets the x-tile DMA pipeline).
        blk = max(8, _round_up(-(-B // 2), 8))
    return blk


@functools.partial(jax.jit, static_argnames=("block_b",))
def discriminator_forward(x, params, *, block_b=1024):
    """x: (B, 1024) float32 -> (B, 1) float32 in [0, 1]."""
    w1, b1, w2, b2, w3_row, b3 = params
    B = x.shape[0]
    blk = _choose_block(B, block_b)
    # No wrapper-side cast or pad: x enters the kernel as f32; a ragged tail
    # block is clipped by Pallas (rows are independent, so any garbage tail rows
    # in the VMEM buffer never reach the (B, 1) output array).
    return _pallas_forward(x, w1, b1, w2, b2, w3_row, b3, blk)


def init_params(key):
    """Deterministic init mimicking PyTorch nn.Linear default (U[-1/sqrt(fan_in), +]).

    Weights feeding the MXU (W1, W2) are stored in bf16 (f32 accumulate in-kernel);
    W3 is kept as an f32 (1, 256) row for the VPU/XLU reduce; biases are f32.
    """
    def linear(k, fan_in, fan_out):
        kw, kb = jax.random.split(k)
        bound = 1.0 / jnp.sqrt(fan_in)
        w = jax.random.uniform(kw, (fan_in, fan_out), jnp.float32, -bound, bound)
        b = jax.random.uniform(kb, (1, fan_out), jnp.float32, -bound, bound)
        return w, b

    k1, k2, k3 = jax.random.split(key, 3)
    w1, b1 = linear(k1, IN_DIM, H1_DIM)
    w2, b2 = linear(k2, H1_DIM, H2_DIM)
    w3, b3 = linear(k3, H2_DIM, OUT_DIM)
    return (w1.astype(jnp.bfloat16), b1,
            w2.astype(jnp.bfloat16), b2,
            w3.reshape(1, H2_DIM), b3.reshape(1, OUT_DIM))


def reference_forward(x, params):
    """f32 reference using the same (bf16-stored) weights upcast to f32."""
    w1, b1, w2, b2, w3_row, b3 = params
    h1 = jnp.maximum(x @ w1.astype(jnp.float32) + b1, 0.0)
    h2 = jnp.maximum(h1 @ w2.astype(jnp.float32) + b2, 0.0)
    return jax.nn.sigmoid(h2 @ w3_row.T + b3)


if __name__ == "__main__":
    key = jax.random.PRNGKey(0)
    kx, kp = jax.random.split(key)

    # Small demo batch; 20 is not a multiple of the chosen tile (16), so this
    # exercises the >=2-grid-step split and the clipped partial tail block.
    B = 20
    x = jax.random.normal(kx, (B, IN_DIM), jnp.float32)
    params = init_params(kp)

    out = discriminator_forward(x, params)
    out = jax.block_until_ready(out)

    ref = reference_forward(x, params)
    assert out.shape == (B, OUT_DIM)
    assert bool(jnp.all(jnp.isfinite(out)))
    # bf16 matmul operands (f32 accumulate) -> loosened tolerance vs f32 reference.
    assert float(jnp.max(jnp.abs(out - ref))) < 2e-2

    print("KERNEL_OK")
</pallas_src>

<mosaic_0001>
module attributes {stable_mosaic.version = 11 : i64} {
  func.func @_mlp_kernel(%arg0: i32, %arg1: memref<16x1024xf32, #tpu.memory_space<vmem>>, %arg2: memref<1024x512xbf16, #tpu.memory_space<vmem>>, %arg3: memref<1x512xf32, #tpu.memory_space<vmem>>, %arg4: memref<512x256xbf16, #tpu.memory_space<vmem>>, %arg5: memref<1x256xf32, #tpu.memory_space<vmem>>, %arg6: memref<1x256xf32, #tpu.memory_space<vmem>>, %arg7: memref<1x1xf32, #tpu.memory_space<vmem>>, %arg8: memref<16x1xf32, #tpu.memory_space<vmem>>) attributes {dimension_semantics = [#tpu.dimension_semantics<parallel>], iteration_bounds = array<i64: 2>, scalar_prefetch = 0 : i64, scratch_operands = 0 : i64, tpu.core_type = #tpu.core_type<tc>, window_params = [{transform_indices = @transform_0, window_bounds = array<i64: 16, 1024>}, {pipeline_mode = #tpu.pipeline_mode<synchronous>, transform_indices = @transform_1, window_bounds = array<i64: 1024, 512>}, {pipeline_mode = #tpu.pipeline_mode<synchronous>, transform_indices = @transform_2, window_bounds = array<i64: 1, 512>}, {pipeline_mode = #tpu.pipeline_mode<synchronous>, transform_indices = @transform_3, window_bounds = array<i64: 512, 256>}, {pipeline_mode = #tpu.pipeline_mode<synchronous>, transform_indices = @transform_4, window_bounds = array<i64: 1, 256>}, {pipeline_mode = #tpu.pipeline_mode<synchronous>, transform_indices = @transform_5, window_bounds = array<i64: 1, 256>}, {pipeline_mode = #tpu.pipeline_mode<synchronous>, transform_indices = @transform_6, window_bounds = array<i64: 1, 1>}, {transform_indices = @transform_7, window_bounds = array<i64: 16, 1>}]} {
    %c0 = arith.constant 0 : index
    %c0_0 = arith.constant 0 : index
    %0 = vector.load %arg1[%c0, %c0_0] : memref<16x1024xf32, #tpu.memory_space<vmem>>, vector<16x1024xf32>
    %1 = arith.truncf %0 : vector<16x1024xf32> to vector<16x1024xbf16>
    %c0_1 = arith.constant 0 : index
    %c0_2 = arith.constant 0 : index
    %2 = vector.load %arg2[%c0_1, %c0_2] : memref<1024x512xbf16, #tpu.memory_space<vmem>>, vector<1024x512xbf16>
    %cst = arith.constant dense<0.000000e+00> : vector<16x512xf32>
    %3 = tpu.matmul %1, %2, %cst {dimension_numbers = #tpu.dot_dimension_numbers<[1], [0], [0], [1], [0, 0, 1, 1], [], []>} : vector<16x1024xbf16>, vector<1024x512xbf16>, vector<16x512xf32> -> vector<16x512xf32>
    %c0_3 = arith.constant 0 : index
    %c0_4 = arith.constant 0 : index
    %4 = vector.load %arg3[%c0_3, %c0_4] : memref<1x512xf32, #tpu.memory_space<vmem>>, vector<1x512xf32>
    %5 = vector.broadcast %4 : vector<1x512xf32> to vector<16x512xf32>
    %6 = arith.addf %3, %5 : vector<16x512xf32>
    %cst_5 = arith.constant 0.000000e+00 : f32
    %7 = vector.broadcast %cst_5 : f32 to vector<16x512xf32>
    %8 = arith.maximumf %6, %7 : vector<16x512xf32>
    %9 = arith.truncf %8 : vector<16x512xf32> to vector<16x512xbf16>
    %c0_6 = arith.constant 0 : index
    %c0_7 = arith.constant 0 : index
    %10 = vector.load %arg4[%c0_6, %c0_7] : memref<512x256xbf16, #tpu.memory_space<vmem>>, vector<512x256xbf16>
    %cst_8 = arith.constant dense<0.000000e+00> : vector<16x256xf32>
    %11 = tpu.matmul %9, %10, %cst_8 {dimension_numbers = #tpu.dot_dimension_numbers<[1], [0], [0], [1], [0, 0, 1, 1], [], []>} : vector<16x512xbf16>, vector<512x256xbf16>, vector<16x256xf32> -> vector<16x256xf32>
    %c0_9 = arith.constant 0 : index
    %c0_10 = arith.constant 0 : index
    %12 = vector.load %arg5[%c0_9, %c0_10] : memref<1x256xf32, #tpu.memory_space<vmem>>, vector<1x256xf32>
    %13 = vector.broadcast %12 : vector<1x256xf32> to vector<16x256xf32>
    %14 = arith.addf %11, %13 : vector<16x256xf32>
    %cst_11 = arith.constant 0.000000e+00 : f32
    %15 = vector.broadcast %cst_11 : f32 to vector<16x256xf32>
    %16 = arith.maximumf %14, %15 : vector<16x256xf32>
    %c0_12 = arith.constant 0 : index
    %c0_13 = arith.constant 0 : index
    %17 = vector.load %arg6[%c0_12, %c0_13] : memref<1x256xf32, #tpu.memory_space<vmem>>, vector<1x256xf32>
    %18 = vector.broadcast %17 : vector<1x256xf32> to vector<16x256xf32>
    %19 = arith.mulf %16, %18 : vector<16x256xf32>
    %20 = vector.extract_strided_slice %19 {offsets = [0, 0], sizes = [16, 128], strides = [1, 1]} : vector<16x256xf32> to vector<16x128xf32>
    %21 = vector.extract_strided_slice %19 {offsets = [0, 128], sizes = [16, 128], strides = [1, 1]} : vector<16x256xf32> to vector<16x128xf32>
    %22 = arith.addf %20, %21 : vector<16x128xf32>
    %cst_14 = arith.constant dense<0.000000e+00> : vector<16xf32>
    %23 = vector.multi_reduction <add>, %22, %cst_14 [1] : vector<16x128xf32> to vector<16xf32>
    %24 = vector.shape_cast %23 : vector<16xf32> to vector<16x1xf32>
    %c0_15 = arith.constant 0 : index
    %c0_16 = arith.constant 0 : index
    %25 = vector.load %arg7[%c0_15, %c0_16] : memref<1x1xf32, #tpu.memory_space<vmem>>, vector<1x1xf32>
    %26 = vector.broadcast %25 : vector<1x1xf32> to vector<16x1xf32>
    %27 = arith.addf %24, %26 : vector<16x1xf32>
    %28 = arith.negf %27 : vector<16x1xf32>
    %29 = math.exp %28 : vector<16x1xf32>
    %cst_17 = arith.constant 1.000000e+00 : f32
    %30 = vector.broadcast %cst_17 : f32 to vector<16x1xf32>
    %31 = arith.addf %30, %29 : vector<16x1xf32>
    %32 = arith.divf %30, %31 : vector<16x1xf32>
    %c0_18 = arith.constant 0 : index
    %c0_19 = arith.constant 0 : index
    %33 = vector.load %arg8[%c0_18, %c0_19] : memref<16x1xf32, #tpu.memory_space<vmem>>, vector<16x1xf32>
    tpu.vector_store %arg8[%c0_18, %c0_19], %32 {strides = array<i32>} : memref<16x1xf32, #tpu.memory_space<vmem>>, vector<16x1xf32>,
    return
  }
  func.func @transform_0(%arg0: i32) -> (i32, i32) {
    %c0_i32 = arith.constant 0 : i32
    %c0_i32_0 = arith.constant 0 : i32
    return %arg0, %c0_i32 : i32, i32
  }
  func.func @transform_1(%arg0: i32) -> (i32, i32) {
    %c0_i32 = arith.constant 0 : i32
    %c0_i32_0 = arith.constant 0 : i32
    %c0_i32_1 = arith.constant 0 : i32
    return %c0_i32, %c0_i32_0 : i32, i32
  }
  func.func @transform_2(%arg0: i32) -> (i32, i32) {
    %c0_i32 = arith.constant 0 : i32
    %c0_i32_0 = arith.constant 0 : i32
    %c0_i32_1 = arith.constant 0 : i32
    return %c0_i32, %c0_i32_0 : i32, i32
  }
  func.func @transform_3(%arg0: i32) -> (i32, i32) {
    %c0_i32 = arith.constant 0 : i32
    %c0_i32_0 = arith.constant 0 : i32
    %c0_i32_1 = arith.constant 0 : i32
    return %c0_i32, %c0_i32_0 : i32, i32
  }
  func.func @transform_4(%arg0: i32) -> (i32, i32) {
    %c0_i32 = arith.constant 0 : i32
    %c0_i32_0 = arith.constant 0 : i32
    %c0_i32_1 = arith.constant 0 : i32
    return %c0_i32, %c0_i32_0 : i32, i32
  }
  func.func @transform_5(%arg0: i32) -> (i32, i32) {
    %c0_i32 = arith.constant 0 : i32
    %c0_i32_0 = arith.constant 0 : i32
    %c0_i32_1 = arith.constant 0 : i32
    return %c0_i32, %c0_i32_0 : i32, i32
  }
  func.func @transform_6(%arg0: i32) -> (i32, i32) {
    %c0_i32 = arith.constant 0 : i32
    %c0_i32_0 = arith.constant 0 : i32
    %c0_i32_1 = arith.constant 0 : i32
    return %c0_i32, %c0_i32_0 : i32, i32
  }
  func.func @transform_7(%arg0: i32) -> (i32, i32) {
    %c0_i32 = arith.constant 0 : i32
    %c0_i32_0 = arith.constant 0 : i32
    return %arg0, %c0_i32 : i32, i32
  }
}

</mosaic_0001>

<bundles_post_ra>
// kernel: discriminator_forward.1
= control target key start
LH: loop header
LB: loop body
LE: loop exit
PB: predicated region body
PF: predicated region fallthrough
CT: control target
= control target key end

     0   :  { %s5634_s0 = inlined_call_operand.hbm [shape: f32[20,1024], index: 0, kind: input, shape index: {}]   ;;  %s5635_s1 = inlined_call_operand.hbm [shape: bf16[1024,512], index: 1, kind: input, shape index: {}]   ;;  %s5636_s2 = inlined_call_operand.hbm [shape: f32[1,512], index: 2, kind: input, shape index: {}]   ;;  %s5637_s3 = inlined_call_operand.hbm [shape: bf16[512,256], index: 3, kind: input, shape index: {}]   ;;  %s5638_s4 = inlined_call_operand.vmem [shape: f32[1,256], index: 4, kind: input, shape index: {}]   ;;  %s5639_s5 = inlined_call_operand.vmem [shape: f32[1,256], index: 5, kind: input, shape index: {}]   ;;  %s5640_s6 = inlined_call_operand.<no memory space> [shape: f32[1,1], index: 6, kind: input, shape index: {}]   ;;  %s5641_s7 = inlined_call_operand.vmem [shape: f32[20,1], index: 7, kind: output, shape index: {}]  }
   0x1   :  { %5643 = sst [smem:[#allocation14_spill]] %s5635_s1  ;;  %v12_v0 = vstv %s5640_s6 }
   0x2   :  { %13 = vst [vmem:[#allocation2] sm:$0x1] %v12_v0 }
   0x3   :  { %14 = vsyncpa [#allocation4], 0 }
   0x4   :  { %16 = vsyncpa [#allocation4 + $0x1], 0 }
   0x5   :  { %17 = vsyncpa [#allocation6], 0 }
   0x6   :  { %18 = vsyncpa [#allocation9], 0  ;;  %s5303_s26 = smov 0   ;;  %s5305_s27 = smov 0  }
   0x7   :  { %s5307_s28 = smov 0   ;;  %s5309_s29 = smov 0  }
   0x8 LB: > { %s5322_s6 = sadd.s32 4294967295, %s5216_s29   ;;  %s5325_s30 = sadd.s32 1, %s5216_s29   ;;  %s5216_s29 = sphi %s5309_s29, %s5658_s29   ;;  %s5212_s28 = sphi %s5307_s28, %s5657_s28   ;;  %s5208_s27 = sphi %s5305_s27, %s5656_s27   ;;  %s5204_s26 = sphi %s5303_s26, %s5655_s26  }
   0x9   : > { %s28_s8 = ssub.s32 %s5216_s29, %s5325_s30  ;;  %s31_s9 = sadd.s32 1, %s5212_s28 }
   0xa   : > { %p29_p0 = scmp.eq.s32.totalorder %s28_s8, 0  ;;  %p38_p1 = scmp.ne.s32.totalorder %s5212_s28, %s5208_s27 }
   0xb   : > { %p39_p2 = scmp.eq.s32.totalorder %s5216_s29, 0  ;;  %p44_p3 = scmp.ne.s32.totalorder %s5208_s27, %s5204_s26 }
   0xc   : > { %s5335_s10 = scalar_select %p29_p0, %s5212_s28, %s31_s9  }
   0xd   : > { %p5337_p4 = por %p39_p2, %p38_p1  ;;  %p5642_p5 = scmp.eq.s32.totalorder %s5322_s6, 0 }
   0xe   : > { %p194_p6 = scmp.eq.s32.totalorder %s5322_s6, 1  ;;  %p3225_p7 = scmp.ge.s32.totalorder %s5216_s29, 1 }
   0xf   : > { %p5346_p8 = por %p5642_p5, %p44_p3  ;;  %p207_p9 = scmp.lt.s32.totalorder %s5216_s29, 3 }
  0x10   : > { %p5351_p10 = por %p194_p6, %p38_p1  ;;  %s5648_s1 = sld [smem:[#allocation14_spill]] }
  0x11   : > { %p5355_p11 = pnand %p3225_p7, %p207_p9  ;;  %s5250_s18 = smov [#allocation5]  }
  0x12   : > { %s220_s19 = sshll.u32 %s5250_s18, 4  ;;  %s233_s23 = sshll.u32 %s5636_s2, 4  ;;  %s221_s19 = int_to_ptr.vmem [resolvable:$true] %s220_s19  ;;  %s234_s23 = int_to_ptr.hbm [resolvable:$true] %s233_s23 }
  0x13   : > { %p4883_p12 = pneg %p5355_p11  ;;  %s5251_s24 = smov 256  }
  0x14   : > { %s5252_s25 = smov 16   ;;  %s5253_s26 = smov [#allocation7]  }
  0x15   : > { %p5366_p13 = pnand %p4883_p12, %p5642_p5  ;;  %s235_s8 = sshll.u32 %s5253_s26, 4  ;;  %s236_s8 = int_to_ptr.vmem [resolvable:$true] %s235_s8 }
  0x16   : > { %s218_s17 = sshll.u32 %s5648_s1, 4  ;;  %s244_s16 = sshll.u32 %s5637_s3, 4  ;;  %s219_s17 = int_to_ptr.hbm [resolvable:$true] %s218_s17  ;;  %s245_s16 = int_to_ptr.hbm [resolvable:$true] %s244_s16 }
  0x17   : > { %4886 = dma.hbm_to_vmem [thread:$0]  (!%p5366_p13), %s219_s17, 32768, %s221_s19, [#allocation6], %s5251_s24, %s5251_s24, %s5252_s25  }
  0x18   : > { %4889 = dma.hbm_to_vmem [thread:$0]  (!%p5366_p13), %s234_s23, 64, %s236_s8, [#allocation6]  }
  0x19   : > { %s5254_s18 = smov [#allocation8]   ;;  %s5255_s22 = smov 128  }
  0x1a   : > { %s246_s21 = sshll.u32 %s5254_s18, 4  ;;  %s5256_s1 = smov 8   ;;  %s247_s21 = int_to_ptr.vmem [resolvable:$true] %s246_s21 }
  0x1b   : > { %4892 = dma.hbm_to_vmem [thread:$0]  (!%p5366_p13), %s245_s16, 8192, %s247_s21, [#allocation9], %s5255_s22, %s5255_s22, %s5256_s1  }
  0x1c   : > { %p3229_p0 = scmp.ge.s32.totalorder %s5216_s29, 2 }
  0x1e   : > { %265 = sbr.rel (%p3229_p0) target bundleno = 71 (0x47), region = 40 }
  0x23   : > { %268 = sbr.rel (!%p5337_p4) target bundleno = 71 (0x47), region = 44  ;;  %s269_s17 = sand.u32 (%p5337_p4), 1, %s5212_s28  }
  0x24   : > { %s3231_s19 = sshll.u32 (%p5337_p4), %s5216_s29, 1  ;;  %s3230_s24 = sshll.u32 (%p5337_p4), %s269_s17, 7 }
  0x25   : > { %s275_s25 = ssub.s32 (%p5337_p4), 3, %s3231_s19  ;;  %s5390_s1 = scalar_lea.sflag (%p5337_p4), [#allocation4], %s269_s17 }
  0x26   : > { %p276_p1 = scmp.lt.s32.totalorder (%p5337_p4), %s275_s25, 2  ;;  %s273_s8 = scalar_lea.vmem (%p5337_p4), [#allocation3], %s3230_s24 }
  0x28   : > { %s5660_s25 = smov (!%p276_p1, %s275_s25), 2 }
  0x29   : > { %s4544_s23 = sshll.u32 %s5660_s25, 6 }
  0x2a   : > { %s280_s26 = ssub.s32 128, %s4544_s23 }
  0x2b   : > { %s281_s20 = sshll.u32 %s280_s26, 4 }
  0x2c   : > { %282 = vsyncadd %s5390_s1, %s281_s20  ;;  %p5393_p2 = scmp.ne.s32.totalorder %s4544_s23, 0  ;;  %s4546_s9 = sshll.u32 %s5216_s29, 7 }
  0x2d   : > { %s286_s18 = scalar_lea.hbm %s5634_s0, %s4546_s9  ;;  %s5401_s21 = sshll.u32 %s273_s8, 4  ;;  %s291_s21 = int_to_ptr.vmem [resolvable:$true] %s5401_s21 }
  0x2e   : > { %s288_s22 = sshll.u32 %s286_s18, 4  ;;  %s3238_s17 = sshll.u32 %s5660_s25, 10  ;;  %s5404_s22 = int_to_ptr.hbm [resolvable:$true] %s288_s22 }
  0x2f   : > { %s5103_s19 = sshra.s32 %s5404_s22, 4  ;;  %s5105_s24 = sshrl.u32 %s3238_s17, 4  ;;  %s5104_s19 = int_to_ptr.hbm [resolvable:$true] %s5103_s19 }
  0x30   : > { %s5110_s23 = scalar_lea.hbm %s5104_s19, %s5105_s24  ;;  %s5114_s20 = scalar_lea.hbm %s5634_s0, 192 }
  0x31   : > { %p5111_p3 = scmp.ne.s32.totalorder %s5104_s19, %s5110_s23  ;;  %p5115_p7 = scmp.lt.s32.totalorder %s5104_s19, %s5634_s0 }
  0x32   : > { %p5116_p9 = scmp.lt.s32.totalorder %s5114_s20, %s5110_s23 }
  0x33   : > { %p5112_p4 = pnand %p5111_p3, %p5393_p2 }
  0x34   : > { %p5117_p12 = por %p5116_p9, %p5115_p7 }
  0x35   : > { %p5113_p6 = pneg %p5112_p4 }
  0x37   : > { %p5118_p13 = pnand %p5117_p12, %p5113_p6 }
  0x39   : > { %5121 = shalt.err (!%p5118_p13)
}
  0x3a   : > { %s5122_s15 = sshra.s32 %s291_s21, 4  ;;  %s5257_s18 = smov [#allocation3]   ;;  %s5123_s15 = int_to_ptr.vmem [resolvable:$true] %s5122_s15 }
  0x3b   : > { %s5129_s16 = scalar_lea.vmem %s5123_s15, %s5105_s24  ;;  %s5133_s29 = scalar_lea.vmem %s5257_s18, 256 }
  0x3c   : > { %p5130_p0 = scmp.ne.s32.totalorder %s5123_s15, %s5129_s16  ;;  %p5135_p4 = scmp.lt.s32.totalorder %s5133_s29, %s5129_s16 }
  0x3e   : > { %p5131_p1 = pnand %p5130_p0, %p5393_p2 }
  0x40   : > { %p5132_p3 = pneg %p5131_p1 }
  0x42   : > { %p5137_p5 = pnand %p5135_p4, %p5132_p3 }
  0x44   : > { %5140 = shalt.err (!%p5137_p5)
}
  0x45   : > { %s5258_s19 = smov 1024   ;;  %s5259_s23 = smov 64  }
  0x46   : > { %296 = dma.hbm_to_vmem [thread:$0]  (%p5393_p2), %s5404_s22, %s3238_s17, %s291_s21, %s5390_s1, %s5258_s19, %s5258_s19, %s5259_s23  }
  0x47 PF: > { %302 = sbr.rel (%p5355_p11) target bundleno = 843 (0x34b), region = 48  ;;  %s5433_s24 = sand.u32 (!%p5355_p11), 1, %s5208_s27  }
  0x48   : > { %s3240_s26 = sshll.u32 (!%p5355_p11), %s5433_s24, 7  ;;  %s305_s20 = scalar_lea.sflag (!%p5355_p11), [#allocation4], %s5433_s24 }
  0x49   : > { %s5437_s8 = scalar_lea.vmem (!%p5355_p11), [#allocation3], %s3240_s26 }
  0x4c   : > { %5191 = dma.done.wait (%p5346_p8), %s305_s20, 2048  }
  0x4d   : > { %5193 = vsyncadd (%p5346_p8), %s305_s20, 4294965248  ;;  %p5651_p5 = scmp.eq.s32.totalorder %s5322_s6, 0 }
  0x4f   : > { %5195 = dma.done.wait (%p5651_p5), [#allocation6], 32832   ;;  %p5652_p11 = pmov %p5651_p5 }
  0x50   : > { %p5653_p2 = pmov %p5651_p5 }
  0x51   : > { %5197 = vsyncadd (%p5652_p11), [#allocation6], 4294934464 }
  0x52   : > { %5199 = dma.done.wait (%p5653_p2), [#allocation9], 8192   ;;  %p5654_p6 = pmov %p5653_p2 }
  0x53   : > { %v3359_v1 = vld [vmem:[#allocation5 + $0xe0] sm:$0xf]  ;;  %v4577_v2 = vld [vmem:[#allocation5 + $0xec] sm:$0xf0]  ;;  %s3244_s11 = sshll.u32 %s5433_s24, 4  ;;  %vm2961_vm2 = vcmask 7168  }
  0x54   : > { %5201 = vsyncadd (%p5654_p6), [#allocation9], 4294959104  ;;  %v3487_v3 = vld [vmem:[#allocation5 + $0x1e0] sm:$0xf]  ;;  %v3360_v4 = vor.u32 %v4577_v2, %v3359_v1  ;;  %v4609_v5 = vld [vmem:[#allocation5 + $0x1ec] sm:$0xf0] }
  0x55   : > { %v3615_v6 = vld [vmem:[#allocation5 + $0x2e0] sm:$0xf]  ;;  %v4641_v7 = vld [vmem:[#allocation5 + $0x2ec] sm:$0xf0]  ;;  %v3488_v8 = vor.u32 %v4609_v5, %v3487_v3  ;;  %s5584_s21 = scalar_lea.vmem [#allocation10], %s3244_s11   ;;  %s4528_s22 = sshll.u32 (%p5351_p10), %s5322_s6, 1 }
  0x56   : > { %v3616_v9 = vor.u32 %v4641_v7, %v3615_v6  ;;  %v3743_v10 = vld [vmem:[#allocation5 + $0x3e0] sm:$0xf]  ;;  %v4673_v11 = vld [vmem:[#allocation5 + $0x3ec] sm:$0xf0]  ;;  %1935 = vmatpush.bf16.msra.mxu0 %v3360_v4  ;;  %s4867_s17 = sshll.u32 (%p5351_p10), %s5322_s6, 4  ;;  %s2972_s9 = ssub.s32 (%p5351_p10), 3, %s4528_s22 }
  0x57   : > { %v3343_v12 = vld [vmem:[#allocation5 + $0xc0] sm:$0xf]  ;;  %v3744_v13 = vor.u32 %v4673_v11, %v3743_v10  ;;  %v4573_v14 = vld [vmem:[#allocation5 + $0xcc] sm:$0xf0]  ;;  %1949 = vmatpush.bf16.msra.mxu1 %v3488_v8  ;;  %s5597_s18 = scalar_lea.vmem (%p5351_p10), %s5641_s7, %s4867_s17   ;;  %p2973_p8 = scmp.lt.s32.totalorder (%p5351_p10), %s2972_s9, 2 }
  0x58   : > { %v3471_v15 = vld [vmem:[#allocation5 + $0x1c0] sm:$0xf]  ;;  %v4605_v16 = vld [vmem:[#allocation5 + $0x1cc] sm:$0xf0]  ;;  %1963 = vmatpush.bf16.msra.mxu2 %v3616_v9  ;;  %v3344_v17 = vor.u32 %v4573_v14, %v3343_v12 }
  0x59   : > { %v3472_v18 = vor.u32 %v4605_v16, %v3471_v15  ;;  %v3599_v19 = vld [vmem:[#allocation5 + $0x2c0] sm:$0xf]  ;;  %v4637_v20 = vld [vmem:[#allocation5 + $0x2cc] sm:$0xf0]  ;;  %1977 = vmatpush.bf16.msra.mxu3 %v3744_v13 }
  0x5a   : > { %v3727_v21 = vld [vmem:[#allocation5 + $0x3c0] sm:$0xf]  ;;  %v3600_v22 = vor.u32 %v4637_v20, %v3599_v19  ;;  %v4669_v23 = vld [vmem:[#allocation5 + $0x3cc] sm:$0xf0]  ;;  %1936 = vmatpush.bf16.msra.mxu0 %v3344_v17 }
  0x5b   : > { %v3327_v24 = vld [vmem:[#allocation5 + $0xa0] sm:$0xf]  ;;  %v4569_v25 = vld [vmem:[#allocation5 + $0xac] sm:$0xf0]  ;;  %v3728_v26 = vor.u32 %v4669_v23, %v3727_v21  ;;  %1950 = vmatpush.bf16.msra.mxu1 %v3472_v18 }
  0x5c   : > { %v3455_v27 = vld [vmem:[#allocation5 + $0x1a0] sm:$0xf]  ;;  %v4601_v28 = vld [vmem:[#allocation5 + $0x1ac] sm:$0xf0]  ;;  %v3328_v30 = vor.u32 %v4569_v25, %v3327_v24  ;;  %1964 = vmatpush.bf16.msra.mxu2 %v3600_v22 }
  0x5d   : > { %v3583_v29 = vld [vmem:[#allocation5 + $0x2a0] sm:$0xf]  ;;  %v4633_v31 = vld [vmem:[#allocation5 + $0x2ac] sm:$0xf0]  ;;  %v3456_v34 = vor.u32 %v4601_v28, %v3455_v27  ;;  %1978 = vmatpush.bf16.msra.mxu3 %v3728_v26 }
  0x5e   : > { %v3711_v32 = vld [vmem:[#allocation5 + $0x3a0] sm:$0xf]  ;;  %v4665_v33 = vld [vmem:[#allocation5 + $0x3ac] sm:$0xf0]  ;;  %v3584_v35 = vor.u32 %v4633_v31, %v3583_v29  ;;  %1937 = vmatpush.bf16.msra.mxu0 %v3328_v30 }
  0x5f   : > { %v3311_v36 = vld [vmem:[#allocation5 + $0x80] sm:$0xf]  ;;  %v4565_v37 = vld [vmem:[#allocation5 + $0x8c] sm:$0xf0]  ;;  %v3712_v39 = vor.u32 %v4665_v33, %v3711_v32  ;;  %1951 = vmatpush.bf16.msra.mxu1 %v3456_v34 }
  0x60   : > { %v3439_v38 = vld [vmem:[#allocation5 + $0x180] sm:$0xf]  ;;  %v4597_v40 = vld [vmem:[#allocation5 + $0x18c] sm:$0xf0]  ;;  %v3312_v45 = vor.u32 %v4565_v37, %v3311_v36  ;;  %1965 = vmatpush.bf16.msra.mxu2 %v3584_v35 }
  0x61   : > { %v3567_v41 = vld [vmem:[#allocation5 + $0x280] sm:$0xf]  ;;  %v4629_v42 = vld [vmem:[#allocation5 + $0x28c] sm:$0xf0]  ;;  %v3440_v46 = vor.u32 %v4597_v40, %v3439_v38  ;;  %1979 = vmatpush.bf16.msra.mxu3 %v3712_v39 }
  0x62   : > { %v3695_v43 = vld [vmem:[#allocation5 + $0x380] sm:$0xf]  ;;  %v4661_v44 = vld [vmem:[#allocation5 + $0x38c] sm:$0xf0]  ;;  %v3568_v47 = vor.u32 %v4629_v42, %v3567_v41  ;;  %1938 = vmatpush.bf16.msra.mxu0 %v3312_v45 }
  0x63   : > { %v3295_v48 = vld [vmem:[#allocation5 + $0x60] sm:$0xf]  ;;  %v4561_v49 = vld [vmem:[#allocation5 + $0x6c] sm:$0xf0]  ;;  %v3696_v51 = vor.u32 %v4661_v44, %v3695_v43  ;;  %1952 = vmatpush.bf16.msra.mxu1 %v3440_v46 }
  0x64   : > { %v3423_v50 = vld [vmem:[#allocation5 + $0x160] sm:$0xf]  ;;  %v4593_v52 = vld [vmem:[#allocation5 + $0x16c] sm:$0xf0]  ;;  %v3296_v57 = vor.u32 %v4561_v49, %v3295_v48  ;;  %1966 = vmatpush.bf16.msra.mxu2 %v3568_v47 }
  0x65   : > { %v3551_v53 = vld [vmem:[#allocation5 + $0x260] sm:$0xf]  ;;  %v4625_v54 = vld [vmem:[#allocation5 + $0x26c] sm:$0xf0]  ;;  %v3424_v58 = vor.u32 %v4593_v52, %v3423_v50  ;;  %1980 = vmatpush.bf16.msra.mxu3 %v3696_v51 }
  0x66   : > { %v3679_v55 = vld [vmem:[#allocation5 + $0x360] sm:$0xf]  ;;  %v4657_v56 = vld [vmem:[#allocation5 + $0x36c] sm:$0xf0]  ;;  %v3552_v59 = vor.u32 %v4625_v54, %v3551_v53  ;;  %1939 = vmatpush.bf16.msra.mxu0 %v3296_v57 }
  0x67   : > { %v3279_v60 = vld [vmem:[#allocation5 + $0x40] sm:$0xf]  ;;  %v4557_v61 = vld [vmem:[#allocation5 + $0x4c] sm:$0xf0]  ;;  %v3680_v63 = vor.u32 %v4657_v56, %v3679_v55  ;;  %1953 = vmatpush.bf16.msra.mxu1 %v3424_v58 }
  0x68   : > { %v3407_v62 = vld [vmem:[#allocation5 + $0x140] sm:$0xf]  ;;  %v4589_v0 = vld [vmem:[#allocation5 + $0x14c] sm:$0xf0]  ;;  %v3280_v5 = vor.u32 %v4557_v61, %v3279_v60  ;;  %1967 = vmatpush.bf16.msra.mxu2 %v3552_v59 }
  0x69   : > { %v3535_v1 = vld [vmem:[#allocation5 + $0x240] sm:$0xf]  ;;  %v4621_v2 = vld [vmem:[#allocation5 + $0x24c] sm:$0xf0]  ;;  %v3408_v6 = vor.u32 %v4589_v0, %v3407_v62  ;;  %1981 = vmatpush.bf16.msra.mxu3 %v3680_v63 }
  0x6a   : > { %v3663_v3 = vld [vmem:[#allocation5 + $0x340] sm:$0xf]  ;;  %v4653_v4 = vld [vmem:[#allocation5 + $0x34c] sm:$0xf0]  ;;  %v3536_v7 = vor.u32 %v4621_v2, %v3535_v1  ;;  %1940 = vmatpush.bf16.msra.mxu0 %v3280_v5 }
  0x6b   : > { %v3263_v8 = vld [vmem:[#allocation5 + $0x20] sm:$0xf]  ;;  %v4553_v9 = vld [vmem:[#allocation5 + $0x2c] sm:$0xf0]  ;;  %v3664_v11 = vor.u32 %v4653_v4, %v3663_v3  ;;  %1954 = vmatpush.bf16.msra.mxu1 %v3408_v6 }
  0x6c   : > { %v3391_v10 = vld [vmem:[#allocation5 + $0x120] sm:$0xf]  ;;  %v4585_v12 = vld [vmem:[#allocation5 + $0x12c] sm:$0xf0]  ;;  %v3264_v17 = vor.u32 %v4553_v9, %v3263_v8  ;;  %1968 = vmatpush.bf16.msra.mxu2 %v3536_v7  ;;  %v366_v7 = vld [vmem:[%s5437_s8 + $0x8] sm:$0xff] }
  0x6d   : > { %v3519_v13 = vld [vmem:[#allocation5 + $0x220] sm:$0xf]  ;;  %v4617_v14 = vld [vmem:[#allocation5 + $0x22c] sm:$0xf0]  ;;  %v3392_v20 = vor.u32 %v4585_v12, %v3391_v10  ;;  %1982 = vmatpush.bf16.msra.mxu3 %v3664_v11  ;;  %v374_v8 = vld [vmem:[%s5437_s8 + $0x48] sm:$0xff] }
  0x6e   : > { %v3647_v15 = vld [vmem:[#allocation5 + $0x320] sm:$0xf]  ;;  %v4649_v16 = vld [vmem:[#allocation5 + $0x32c] sm:$0xf0]  ;;  %v3520_v21 = vor.u32 %v4617_v14, %v3519_v13  ;;  %1941 = vmatpush.bf16.msra.mxu0 %v3264_v17  ;;  %v368_v9 = vld [vmem:[%s5437_s8 + $0x18] sm:$0xff]  ;;  %v5464_v11 = vpack.c.bf16 %v374_v8, %v366_v7 }
  0x6f   : > { %v3247_v18 = vld [vmem:[#allocation5] sm:$0xf]  ;;  %v4549_v19 = vld [vmem:[#allocation5 + $0xc] sm:$0xf0]  ;;  %v3648_v25 = vor.u32 %v4649_v16, %v3647_v15  ;;  %1955 = vmatpush.bf16.msra.mxu1 %v3392_v20  ;;  %v376_v12 = vld [vmem:[%s5437_s8 + $0x58] sm:$0xff] }
  0x70   : > { %v3375_v22 = vld [vmem:[#allocation5 + $0x100] sm:$0xf]  ;;  %v4581_v23 = vld [vmem:[#allocation5 + $0x10c] sm:$0xf0]  ;;  %v3248_v32 = vor.u32 %v4549_v19, %v3247_v18  ;;  %1969 = vmatpush.bf16.msra.mxu2 %v3520_v21  ;;  %v5467_v18 = vpack.c.bf16 %v376_v12, %v368_v9 }
  0x71   : > { %v3503_v24 = vld [vmem:[#allocation5 + $0x200] sm:$0xf]  ;;  %v4613_v26 = vld [vmem:[#allocation5 + $0x20c] sm:$0xf0]  ;;  %v3376_v36 = vor.u32 %v4581_v23, %v3375_v22  ;;  %1983 = vmatpush.bf16.msra.mxu3 %v3648_v25 }
  0x72   : > { %v3631_v27 = vld [vmem:[#allocation5 + $0x300] sm:$0xf]  ;;  %v4645_v28 = vld [vmem:[#allocation5 + $0x30c] sm:$0xf0]  ;;  %v3504_v37 = vor.u32 %v4613_v26, %v3503_v24  ;;  %1942 = vmatpush.bf16.msra.mxu0 %v3248_v32 }
  0x73   : > { %v3871_v29 = vld [vmem:[#allocation5 + $0x4e0] sm:$0xf]  ;;  %v4705_v30 = vld [vmem:[#allocation5 + $0x4ec] sm:$0xf0]  ;;  %v3632_v40 = vor.u32 %v4645_v28, %v3631_v27  ;;  %1956 = vmatpush.bf16.msra.mxu1 %v3376_v36 }
  0x74   : > { %v3999_v31 = vld [vmem:[#allocation5 + $0x5e0] sm:$0xf]  ;;  %v4737_v33 = vld [vmem:[#allocation5 + $0x5ec] sm:$0xf0]  ;;  %v3872_v41 = vor.u32 %v4705_v30, %v3871_v29  ;;  %1970 = vmatpush.bf16.msra.mxu2 %v3504_v37 }
  0x75   : > { %v4127_v34 = vld [vmem:[#allocation5 + $0x6e0] sm:$0xf]  ;;  %v4769_v35 = vld [vmem:[#allocation5 + $0x6ec] sm:$0xf0]  ;;  %v4000_v44 = vor.u32 %v4737_v33, %v3999_v31  ;;  %1984 = vmatpush.bf16.msra.mxu3 %v3632_v40 }
  0x76   : > { %v4255_v38 = vld [vmem:[#allocation5 + $0x7e0] sm:$0xf]  ;;  %v4801_v39 = vld [vmem:[#allocation5 + $0x7ec] sm:$0xf0]  ;;  %v4128_v45 = vor.u32 %v4769_v35, %v4127_v34  ;;  %1991 = vmatpush.bf16.msrb.mxu0 %v3872_v41  ;;  %1957 = vmatmul.bf16.vlgmr.msra.gmra.mxu1 %v5464_v11 }
  0x77   : > { %v3855_v42 = vld [vmem:[#allocation5 + $0x4c0] sm:$0xf]  ;;  %v4701_v43 = vld [vmem:[#allocation5 + $0x4cc] sm:$0xf0]  ;;  %v4256_v49 = vor.u32 %v4801_v39, %v4255_v38  ;;  %2005 = vmatpush.bf16.msrb.mxu1 %v4000_v44 }
  0x78   : > { %v3983_v46 = vld [vmem:[#allocation5 + $0x5c0] sm:$0xf]  ;;  %v4733_v47 = vld [vmem:[#allocation5 + $0x5cc] sm:$0xf0]  ;;  %v3856_v56 = vor.u32 %v4701_v43, %v3855_v42  ;;  %2019 = vmatpush.bf16.msrb.mxu2 %v4128_v45  ;;  %1985 = vmatmul.bf16.vlgmr.msra.gmra.mxu3 %v5467_v18 }
  0x79   : > { %v4111_v48 = vld [vmem:[#allocation5 + $0x6c0] sm:$0xf]  ;;  %v4765_v50 = vld [vmem:[#allocation5 + $0x6cc] sm:$0xf0]  ;;  %v3984_v61 = vor.u32 %v4733_v47, %v3983_v46  ;;  %2033 = vmatpush.bf16.msrb.mxu3 %v4256_v49 }
  0x7a   : > { %v4239_v51 = vld [vmem:[#allocation5 + $0x7c0] sm:$0xf]  ;;  %v4797_v52 = vld [vmem:[#allocation5 + $0x7cc] sm:$0xf0]  ;;  %v4112_v62 = vor.u32 %v4765_v50, %v4111_v48  ;;  %1992 = vmatpush.bf16.msrb.mxu0 %v3856_v56 }
  0x7b   : > { %v365_v53 = vld [vmem:[%s5437_s8] sm:$0xff]  ;;  %v367_v55 = vld [vmem:[%s5437_s8 + $0x10] sm:$0xff]  ;;  %v4240_v3 = vor.u32 %v4797_v52, %v4239_v51  ;;  %2006 = vmatpush.bf16.msrb.mxu1 %v3984_v61 }
  0x7c   : > { %v373_v54 = vld [vmem:[%s5437_s8 + $0x40] sm:$0xff]  ;;  %v4697_v58 = vld [vmem:[#allocation5 + $0x4ac] sm:$0xf0]  ;;  %2020 = vmatpush.bf16.msrb.mxu2 %v4112_v62 }
  0x7d   : > { %v3839_v57 = vld [vmem:[#allocation5 + $0x4a0] sm:$0xf]  ;;  %v5454_v59 = vpack.c.bf16 %v373_v54, %v365_v53  ;;  %v375_v60 = vld [vmem:[%s5437_s8 + $0x50] sm:$0xff]  ;;  %2034 = vmatpush.bf16.msrb.mxu3 %v4240_v3 }
  0x7e   : > { %v3967_v63 = vld [vmem:[#allocation5 + $0x5a0] sm:$0xf]  ;;  %v4729_v0 = vld [vmem:[#allocation5 + $0x5ac] sm:$0xf0]  ;;  %v5457_v2 = vpack.c.bf16 %v375_v60, %v367_v55  ;;  %v3840_v10 = vor.u32 %v4697_v58, %v3839_v57 }
  0x7f   : > { %v4095_v1 = vld [vmem:[#allocation5 + $0x6a0] sm:$0xf]  ;;  %v4761_v4 = vld [vmem:[#allocation5 + $0x6ac] sm:$0xf0]  ;;  %1943 = vmatmul.bf16.vlgmr.msra.gmra.mxu0 %v5454_v59  ;;  %v3968_v13 = vor.u32 %v4729_v0, %v3967_v63 }
  0x80   : > { %v4223_v5 = vld [vmem:[#allocation5 + $0x7a0] sm:$0xf]  ;;  %v4793_v6 = vld [vmem:[#allocation5 + $0x7ac] sm:$0xf0]  ;;  %1971 = vmatmul.bf16.vlgmr.msra.gmra.mxu2 %v5457_v2  ;;  %v4096_v14 = vor.u32 %v4761_v4, %v4095_v1  ;;  %1993 = vmatpush.bf16.msrb.mxu0 %v3840_v10  ;;  %v4575_v10 = vld [vmem:[#allocation5 + $0xe4] sm:$0xf] }
  0x81   : > { %v3823_v15 = vld [vmem:[#allocation5 + $0x480] sm:$0xf]  ;;  %v4693_v16 = vld [vmem:[#allocation5 + $0x48c] sm:$0xf0]  ;;  %v4224_v19 = vor.u32 %v4793_v6, %v4223_v5  ;;  %2007 = vmatpush.bf16.msrb.mxu1 %v3968_v13  ;;  %v3361_v13 = vld [vmem:[#allocation5 + $0xf0] sm:$0xf0] }
  0x82   : > { %v3951_v17 = vld [vmem:[#allocation5 + $0x580] sm:$0xf]  ;;  %v4725_v20 = vld [vmem:[#allocation5 + $0x58c] sm:$0xf0]  ;;  %v3824_v25 = vor.u32 %v4693_v16, %v3823_v15  ;;  %2021 = vmatpush.bf16.msrb.mxu2 %v4096_v14  ;;  %v4607_v14 = vld [vmem:[#allocation5 + $0x1e4] sm:$0xf] }
  0x83   : > { %v4079_v21 = vld [vmem:[#allocation5 + $0x680] sm:$0xf]  ;;  %v4757_v22 = vld [vmem:[#allocation5 + $0x68c] sm:$0xf0]  ;;  %v3952_v26 = vor.u32 %v4725_v20, %v3951_v17  ;;  %2035 = vmatpush.bf16.msrb.mxu3 %v4224_v19  ;;  %v3489_v15 = vld [vmem:[#allocation5 + $0x1f0] sm:$0xf0] }
  0x84   : > { %v4207_v23 = vld [vmem:[#allocation5 + $0x780] sm:$0xf]  ;;  %v4789_v24 = vld [vmem:[#allocation5 + $0x78c] sm:$0xf0]  ;;  %v4080_v27 = vor.u32 %v4757_v22, %v4079_v21  ;;  %1994 = vmatpush.bf16.msrb.mxu0 %v3824_v25  ;;  %v4639_v16 = vld [vmem:[#allocation5 + $0x2e4] sm:$0xf] }
  0x85   : > { %v3807_v28 = vld [vmem:[#allocation5 + $0x460] sm:$0xf]  ;;  %v4689_v29 = vld [vmem:[#allocation5 + $0x46c] sm:$0xf0]  ;;  %v4208_v31 = vor.u32 %v4789_v24, %v4207_v23  ;;  %2008 = vmatpush.bf16.msrb.mxu1 %v3952_v26  ;;  %v3617_v17 = vld [vmem:[#allocation5 + $0x2f0] sm:$0xf0] }
  0x86   : > { %v3935_v30 = vld [vmem:[#allocation5 + $0x560] sm:$0xf]  ;;  %v4721_v32 = vld [vmem:[#allocation5 + $0x56c] sm:$0xf0]  ;;  %v3808_v37 = vor.u32 %v4689_v29, %v3807_v28  ;;  %2022 = vmatpush.bf16.msrb.mxu2 %v4080_v27  ;;  %v4671_v19 = vld [vmem:[#allocation5 + $0x3e4] sm:$0xf] }
  0x87   : > { %v4063_v33 = vld [vmem:[#allocation5 + $0x660] sm:$0xf]  ;;  %v4753_v34 = vld [vmem:[#allocation5 + $0x66c] sm:$0xf0]  ;;  %v3936_v38 = vor.u32 %v4721_v32, %v3935_v30  ;;  %2036 = vmatpush.bf16.msrb.mxu3 %v4208_v31  ;;  %v3745_v21 = vld [vmem:[#allocation5 + $0x3f0] sm:$0xf0]  ;;  %v3364_v30 = vor.u32 %v4575_v10, %v3361_v13 }
  0x88   : > { %v4191_v35 = vld [vmem:[#allocation5 + $0x760] sm:$0xf]  ;;  %v4785_v36 = vld [vmem:[#allocation5 + $0x76c] sm:$0xf0]  ;;  %v4064_v39 = vor.u32 %v4753_v34, %v4063_v33  ;;  %1995 = vmatpush.bf16.msrb.mxu0 %v3808_v37  ;;  %v370_v28 = vld [vmem:[%s5437_s8 + $0x28] sm:$0xff]  ;;  %v3492_v34 = vor.u32 %v4607_v14, %v3489_v15 }
  0x89   : > { %v3791_v40 = vld [vmem:[#allocation5 + $0x440] sm:$0xf]  ;;  %v4685_v41 = vld [vmem:[#allocation5 + $0x44c] sm:$0xf0]  ;;  %v4192_v43 = vor.u32 %v4785_v36, %v4191_v35  ;;  %2009 = vmatpush.bf16.msrb.mxu1 %v3936_v38  ;;  %v378_v31 = vld [vmem:[%s5437_s8 + $0x68] sm:$0xff]  ;;  %v3620_v35 = vor.u32 %v4639_v16, %v3617_v17 }
  0x8a   : > { %v3919_v42 = vld [vmem:[#allocation5 + $0x540] sm:$0xf]  ;;  %v4717_v44 = vld [vmem:[#allocation5 + $0x54c] sm:$0xf0]  ;;  %v3792_v49 = vor.u32 %v4685_v41, %v3791_v40  ;;  %2023 = vmatpush.bf16.msrb.mxu2 %v4064_v39  ;;  %v372_v32 = vld [vmem:[%s5437_s8 + $0x38] sm:$0xff]  ;;  %v3748_v39 = vor.u32 %v4671_v19, %v3745_v21 }
  0x8b   : > { %v4047_v45 = vld [vmem:[#allocation5 + $0x640] sm:$0xf]  ;;  %v4749_v46 = vld [vmem:[#allocation5 + $0x64c] sm:$0xf0]  ;;  %v3920_v51 = vor.u32 %v4717_v44, %v3919_v42  ;;  %2037 = vmatpush.bf16.msrb.mxu3 %v4192_v43  ;;  %v380_v33 = vld [vmem:[%s5437_s8 + $0x78] sm:$0xff] }
  0x8c   : > { %v4175_v47 = vld [vmem:[#allocation5 + $0x740] sm:$0xf]  ;;  %v4781_v48 = vld [vmem:[#allocation5 + $0x74c] sm:$0xf0]  ;;  %v4048_v52 = vor.u32 %v4749_v46, %v4047_v45  ;;  %1996 = vmatpush.bf16.msrb.mxu0 %v3792_v49  ;;  %v4571_v36 = vld [vmem:[#allocation5 + $0xc4] sm:$0xf]  ;;  %v5483_v45 = vpack.c.bf16 %v378_v31, %v370_v28 }
  0x8d   : > { %v3775_v50 = vld [vmem:[#allocation5 + $0x420] sm:$0xf]  ;;  %v4681_v53 = vld [vmem:[#allocation5 + $0x42c] sm:$0xf0]  ;;  %v4176_v56 = vor.u32 %v4781_v48, %v4175_v47  ;;  %2010 = vmatpush.bf16.msrb.mxu1 %v3920_v51  ;;  %v3345_v37 = vld [vmem:[#allocation5 + $0xd0] sm:$0xf0]  ;;  %v5485_v48 = vpack.c.bf16 %v380_v33, %v372_v32 }
  0x8e   : > { %v3903_v54 = vld [vmem:[#allocation5 + $0x520] sm:$0xf]  ;;  %v4713_v55 = vld [vmem:[#allocation5 + $0x52c] sm:$0xf0]  ;;  %v3776_v0 = vor.u32 %v4681_v53, %v3775_v50  ;;  %2024 = vmatpush.bf16.msrb.mxu2 %v4048_v52  ;;  %v4603_v38 = vld [vmem:[#allocation5 + $0x1c4] sm:$0xf]  ;;  %v3348_v49 = vor.u32 %v4571_v36, %v3345_v37 }
  0x8f   : > { %v4031_v57 = vld [vmem:[#allocation5 + $0x620] sm:$0xf]  ;;  %v4745_v58 = vld [vmem:[#allocation5 + $0x62c] sm:$0xf0]  ;;  %v3904_v6 = vor.u32 %v4713_v55, %v3903_v54  ;;  %2038 = vmatpush.bf16.msrb.mxu3 %v4176_v56  ;;  %v3473_v41 = vld [vmem:[#allocation5 + $0x1d0] sm:$0xf0] }
  0x90   : > { %v4159_v60 = vld [vmem:[#allocation5 + $0x720] sm:$0xf]  ;;  %v4777_v61 = vld [vmem:[#allocation5 + $0x72c] sm:$0xf0]  ;;  %v4032_v7 = vor.u32 %v4745_v58, %v4031_v57  ;;  %1997 = vmatpush.bf16.msrb.mxu0 %v3776_v0  ;;  %v4635_v42 = vld [vmem:[#allocation5 + $0x2c4] sm:$0xf]  ;;  %v3476_v50 = vor.u32 %v4603_v38, %v3473_v41 }
  0x91   : > { %v3759_v62 = vld [vmem:[#allocation5 + $0x400] sm:$0xf]  ;;  %v4677_v63 = vld [vmem:[#allocation5 + $0x40c] sm:$0xf0]  ;;  %v4160_v12 = vor.u32 %v4777_v61, %v4159_v60  ;;  %2011 = vmatpush.bf16.msrb.mxu1 %v3904_v6  ;;  %v3601_v43 = vld [vmem:[#allocation5 + $0x2d0] sm:$0xf0] }
  0x92   : > { %v3887_v1 = vld [vmem:[#allocation5 + $0x500] sm:$0xf]  ;;  %v4709_v3 = vld [vmem:[#allocation5 + $0x50c] sm:$0xf0]  ;;  %v3760_v20 = vor.u32 %v4677_v63, %v3759_v62  ;;  %2025 = vmatpush.bf16.msrb.mxu2 %v4032_v7  ;;  %v4667_v46 = vld [vmem:[#allocation5 + $0x3c4] sm:$0xf]  ;;  %v3604_v51 = vor.u32 %v4635_v42, %v3601_v43 }
  0x93   : > { %v4015_v4 = vld [vmem:[#allocation5 + $0x600] sm:$0xf]  ;;  %v4741_v5 = vld [vmem:[#allocation5 + $0x60c] sm:$0xf0]  ;;  %v3888_v24 = vor.u32 %v4709_v3, %v3887_v1  ;;  %2039 = vmatpush.bf16.msrb.mxu3 %v4160_v12  ;;  %v3729_v47 = vld [vmem:[#allocation5 + $0x3d0] sm:$0xf0] }
  0x94   : > { %v4143_v8 = vld [vmem:[#allocation5 + $0x700] sm:$0xf]  ;;  %v4773_v9 = vld [vmem:[#allocation5 + $0x70c] sm:$0xf0]  ;;  %v4016_v25 = vor.u32 %v4741_v5, %v4015_v4  ;;  %1998 = vmatpush.bf16.msrb.mxu0 %v3760_v20  ;;  %v4567_v52 = vld [vmem:[#allocation5 + $0xa4] sm:$0xf]  ;;  %v3732_v55 = vor.u32 %v4667_v46, %v3729_v47 }
  0x95   : > { %v369_v22 = vld [vmem:[%s5437_s8 + $0x20] sm:$0xff]  ;;  %v371_v26 = vld [vmem:[%s5437_s8 + $0x30] sm:$0xff]  ;;  %v4144_v29 = vor.u32 %v4773_v9, %v4143_v8  ;;  %2012 = vmatpush.bf16.msrb.mxu1 %v3888_v24 }
  0x96   : > { %v377_v23 = vld [vmem:[%s5437_s8 + $0x60] sm:$0xff]  ;;  %v379_v27 = vld [vmem:[%s5437_s8 + $0x70] sm:$0xff]  ;;  %2026 = vmatpush.bf16.msrb.mxu2 %v4016_v25 }
  0x97   : > { %v5479_v40 = vpack.c.bf16 %v377_v23, %v369_v22  ;;  %v5481_v44 = vpack.c.bf16 %v379_v27, %v371_v26  ;;  %2040 = vmatpush.bf16.msrb.mxu3 %v4144_v29  ;;  %v3329_v53 = vld [vmem:[#allocation5 + $0xb0] sm:$0xf0]  ;;  %v4599_v54 = vld [vmem:[#allocation5 + $0x1a4] sm:$0xf] }
  0x98   : > { %2047 = vmatpush.bf16.msra.mxu0 %v3364_v30  ;;  %v3457_v56 = vld [vmem:[#allocation5 + $0x1b0] sm:$0xf0]  ;;  %v4631_v57 = vld [vmem:[#allocation5 + $0x2a4] sm:$0xf]  ;;  %2013 = vmatmul.bf16.vlgmr.msrb.gmra.mxu1 %v5483_v45  ;;  %v3332_v62 = vor.u32 %v4567_v52, %v3329_v53 }
  0x99   : > { %2061 = vmatpush.bf16.msra.mxu1 %v3492_v34  ;;  %1999 = vmatmul.bf16.vlgmr.msrb.gmra.mxu0 %v5479_v40  ;;  %v3585_v58 = vld [vmem:[#allocation5 + $0x2b0] sm:$0xf0]  ;;  %v4663_v60 = vld [vmem:[#allocation5 + $0x3a4] sm:$0xf]  ;;  %v3460_v63 = vor.u32 %v4599_v54, %v3457_v56 }
  0x9a   : > { %2075 = vmatpush.bf16.msra.mxu2 %v3620_v35  ;;  %v3713_v61 = vld [vmem:[#allocation5 + $0x3b0] sm:$0xf0]  ;;  %2041 = vmatmul.bf16.vlgmr.msrb.gmra.mxu3 %v5485_v48  ;;  %v3588_v0 = vor.u32 %v4631_v57, %v3585_v58  ;;  %v4563_v1 = vld [vmem:[#allocation5 + $0x84] sm:$0xf] }
  0x9b   : > { %2089 = vmatpush.bf16.msra.mxu3 %v3748_v39  ;;  %2027 = vmatmul.bf16.vlgmr.msrb.gmra.mxu2 %v5481_v44  ;;  %v3313_v3 = vld [vmem:[#allocation5 + $0x90] sm:$0xf0]  ;;  %v4595_v4 = vld [vmem:[#allocation5 + $0x184] sm:$0xf]  ;;  %v3716_v5 = vor.u32 %v4663_v60, %v3713_v61 }
  0x9c   : > { %2048 = vmatpush.bf16.msra.mxu0 %v3348_v49  ;;  %v3441_v6 = vld [vmem:[#allocation5 + $0x190] sm:$0xf0]  ;;  %v4627_v7 = vld [vmem:[#allocation5 + $0x284] sm:$0xf]  ;;  %v3316_v12 = vor.u32 %v4563_v1, %v3313_v3 }
  0x9d   : > { %2062 = vmatpush.bf16.msra.mxu1 %v3476_v50  ;;  %v3569_v8 = vld [vmem:[#allocation5 + $0x290] sm:$0xf0]  ;;  %v4659_v9 = vld [vmem:[#allocation5 + $0x384] sm:$0xf]  ;;  %v3444_v13 = vor.u32 %v4595_v4, %v3441_v6 }
  0x9e   : > { %2076 = vmatpush.bf16.msra.mxu2 %v3604_v51  ;;  %v3697_v10 = vld [vmem:[#allocation5 + $0x390] sm:$0xf0]  ;;  %v3572_v14 = vor.u32 %v4627_v7, %v3569_v8  ;;  %v4559_v15 = vld [vmem:[#allocation5 + $0x64] sm:$0xf] }
  0x9f   : > { %2090 = vmatpush.bf16.msra.mxu3 %v3732_v55  ;;  %v3297_v16 = vld [vmem:[#allocation5 + $0x70] sm:$0xf0]  ;;  %v4591_v17 = vld [vmem:[#allocation5 + $0x164] sm:$0xf]  ;;  %v3700_v19 = vor.u32 %v4659_v9, %v3697_v10 }
  0xa0   : > { %2049 = vmatpush.bf16.msra.mxu0 %v3332_v62  ;;  %v3425_v20 = vld [vmem:[#allocation5 + $0x170] sm:$0xf0]  ;;  %v4623_v21 = vld [vmem:[#allocation5 + $0x264] sm:$0xf]  ;;  %v3300_v25 = vor.u32 %v4559_v15, %v3297_v16 }
  0xa1   : > { %2063 = vmatpush.bf16.msra.mxu1 %v3460_v63  ;;  %v3553_v22 = vld [vmem:[#allocation5 + $0x270] sm:$0xf0]  ;;  %v4655_v23 = vld [vmem:[#allocation5 + $0x364] sm:$0xf]  ;;  %v3428_v26 = vor.u32 %v4591_v17, %v3425_v20 }
  0xa2   : > { %2077 = vmatpush.bf16.msra.mxu2 %v3588_v0  ;;  %v3681_v24 = vld [vmem:[#allocation5 + $0x370] sm:$0xf0]  ;;  %v3556_v27 = vor.u32 %v4623_v21, %v3553_v22  ;;  %v4555_v28 = vld [vmem:[#allocation5 + $0x44] sm:$0xf] }
  0xa3   : > { %2091 = vmatpush.bf16.msra.mxu3 %v3716_v5  ;;  %v3281_v29 = vld [vmem:[#allocation5 + $0x50] sm:$0xf0]  ;;  %v4587_v30 = vld [vmem:[#allocation5 + $0x144] sm:$0xf]  ;;  %v3684_v31 = vor.u32 %v4655_v23, %v3681_v24 }
  0xa4   : > { %2050 = vmatpush.bf16.msra.mxu0 %v3316_v12  ;;  %v3409_v32 = vld [vmem:[#allocation5 + $0x150] sm:$0xf0]  ;;  %v4619_v33 = vld [vmem:[#allocation5 + $0x244] sm:$0xf]  ;;  %v3284_v37 = vor.u32 %v4555_v28, %v3281_v29 }
  0xa5   : > { %2064 = vmatpush.bf16.msra.mxu1 %v3444_v13  ;;  %v3537_v34 = vld [vmem:[#allocation5 + $0x250] sm:$0xf0]  ;;  %v4651_v35 = vld [vmem:[#allocation5 + $0x344] sm:$0xf]  ;;  %v3412_v38 = vor.u32 %v4587_v30, %v3409_v32 }
  0xa6   : > { %2078 = vmatpush.bf16.msra.mxu2 %v3572_v14  ;;  %v3665_v36 = vld [vmem:[#allocation5 + $0x350] sm:$0xf0]  ;;  %v3540_v39 = vor.u32 %v4619_v33, %v3537_v34  ;;  %v4551_v41 = vld [vmem:[#allocation5 + $0x24] sm:$0xf] }
  0xa7   : > { %2092 = vmatpush.bf16.msra.mxu3 %v3700_v19  ;;  %v3265_v42 = vld [vmem:[#allocation5 + $0x30] sm:$0xf0]  ;;  %v4583_v43 = vld [vmem:[#allocation5 + $0x124] sm:$0xf]  ;;  %v3668_v46 = vor.u32 %v4651_v35, %v3665_v36 }
  0xa8   : > { %2051 = vmatpush.bf16.msra.mxu0 %v3300_v25  ;;  %v3393_v47 = vld [vmem:[#allocation5 + $0x130] sm:$0xf0]  ;;  %v4615_v49 = vld [vmem:[#allocation5 + $0x224] sm:$0xf]  ;;  %v3268_v53 = vor.u32 %v4551_v41, %v3265_v42 }
  0xa9   : > { %2065 = vmatpush.bf16.msra.mxu1 %v3428_v26  ;;  %v3521_v50 = vld [vmem:[#allocation5 + $0x230] sm:$0xf0]  ;;  %v4647_v51 = vld [vmem:[#allocation5 + $0x324] sm:$0xf]  ;;  %v3396_v56 = vor.u32 %v4583_v43, %v3393_v47 }
  0xaa   : > { %2079 = vmatpush.bf16.msra.mxu2 %v3556_v27  ;;  %v3649_v52 = vld [vmem:[#allocation5 + $0x330] sm:$0xf0]  ;;  %v4547_v54 = vld [vmem:[#allocation5 + $0x4] sm:$0xf]  ;;  %v3524_v57 = vor.u32 %v4615_v49, %v3521_v50 }
  0xab   : > { %2093 = vmatpush.bf16.msra.mxu3 %v3684_v31  ;;  %v3249_v55 = vld [vmem:[#allocation5 + $0x10] sm:$0xf0]  ;;  %v4579_v58 = vld [vmem:[#allocation5 + $0x104] sm:$0xf]  ;;  %v3652_v62 = vor.u32 %v4647_v51, %v3649_v52 }
  0xac   : > { %2052 = vmatpush.bf16.msra.mxu0 %v3284_v37  ;;  %v3377_v60 = vld [vmem:[#allocation5 + $0x110] sm:$0xf0]  ;;  %v4611_v61 = vld [vmem:[#allocation5 + $0x204] sm:$0xf]  ;;  %v3252_v6 = vor.u32 %v4547_v54, %v3249_v55 }
  0xad   : > { %2066 = vmatpush.bf16.msra.mxu1 %v3412_v38  ;;  %v3505_v63 = vld [vmem:[#allocation5 + $0x210] sm:$0xf0]  ;;  %v4643_v0 = vld [vmem:[#allocation5 + $0x304] sm:$0xf]  ;;  %v3380_v10 = vor.u32 %v4579_v58, %v3377_v60 }
  0xae   : > { %2080 = vmatpush.bf16.msra.mxu2 %v3540_v39  ;;  %v3633_v1 = vld [vmem:[#allocation5 + $0x310] sm:$0xf0]  ;;  %v4703_v3 = vld [vmem:[#allocation5 + $0x4e4] sm:$0xf]  ;;  %v3508_v12 = vor.u32 %v4611_v61, %v3505_v63 }
  0xaf   : > { %2094 = vmatpush.bf16.msra.mxu3 %v3668_v46  ;;  %v3873_v4 = vld [vmem:[#allocation5 + $0x4f0] sm:$0xf0]  ;;  %v4735_v5 = vld [vmem:[#allocation5 + $0x5e4] sm:$0xf]  ;;  %v3636_v15 = vor.u32 %v4643_v0, %v3633_v1 }
  0xb0   : > { %2053 = vmatpush.bf16.msra.mxu0 %v3268_v53  ;;  %v4001_v7 = vld [vmem:[#allocation5 + $0x5f0] sm:$0xf0]  ;;  %v4767_v8 = vld [vmem:[#allocation5 + $0x6e4] sm:$0xf]  ;;  %v3876_v16 = vor.u32 %v4703_v3, %v3873_v4 }
  0xb1   : > { %v4129_v9 = vld [vmem:[#allocation5 + $0x6f0] sm:$0xf0]  ;;  %2067 = vmatpush.bf16.msra.mxu1 %v3396_v56  ;;  %v4799_v13 = vld [vmem:[#allocation5 + $0x7e4] sm:$0xf]  ;;  %v4004_v17 = vor.u32 %v4735_v5, %v4001_v7 }
  0xb2   : > { %2081 = vmatpush.bf16.msra.mxu2 %v3524_v57  ;;  %v4257_v14 = vld [vmem:[#allocation5 + $0x7f0] sm:$0xf0]  ;;  %v4132_v19 = vor.u32 %v4767_v8, %v4129_v9  ;;  %v4699_v20 = vld [vmem:[#allocation5 + $0x4c4] sm:$0xf] }
  0xb3   : > { %2095 = vmatpush.bf16.msra.mxu3 %v3652_v62  ;;  %v3857_v21 = vld [vmem:[#allocation5 + $0x4d0] sm:$0xf0]  ;;  %v4731_v22 = vld [vmem:[#allocation5 + $0x5c4] sm:$0xf]  ;;  %v4260_v23 = vor.u32 %v4799_v13, %v4257_v14 }
  0xb4   : > { %2054 = vmatpush.bf16.msra.mxu0 %v3252_v6  ;;  %v3985_v24 = vld [vmem:[#allocation5 + $0x5d0] sm:$0xf0]  ;;  %v4763_v25 = vld [vmem:[#allocation5 + $0x6c4] sm:$0xf]  ;;  %v3860_v29 = vor.u32 %v4699_v20, %v3857_v21 }
  0xb5   : > { %v4113_v26 = vld [vmem:[#allocation5 + $0x6d0] sm:$0xf0]  ;;  %2068 = vmatpush.bf16.msra.mxu1 %v3380_v10  ;;  %v4795_v27 = vld [vmem:[#allocation5 + $0x7c4] sm:$0xf]  ;;  %v3988_v30 = vor.u32 %v4731_v22, %v3985_v24 }
  0xb6   : > { %2082 = vmatpush.bf16.msra.mxu2 %v3508_v12  ;;  %v4241_v28 = vld [vmem:[#allocation5 + $0x7d0] sm:$0xf0]  ;;  %v4116_v31 = vor.u32 %v4763_v25, %v4113_v26  ;;  %v4695_v32 = vld [vmem:[#allocation5 + $0x4a4] sm:$0xf] }
  0xb7   : > { %2096 = vmatpush.bf16.msra.mxu3 %v3636_v15  ;;  %v3841_v33 = vld [vmem:[#allocation5 + $0x4b0] sm:$0xf0]  ;;  %v4727_v34 = vld [vmem:[#allocation5 + $0x5a4] sm:$0xf]  ;;  %v4244_v35 = vor.u32 %v4795_v27, %v4241_v28  ;;  %2055 = vmatmul.bf16.vlgmr.msra.gmra.mxu0 %v5454_v59 }
  0xb8   : > { %2103 = vmatpush.bf16.msrb.mxu0 %v3876_v16  ;;  %v3969_v36 = vld [vmem:[#allocation5 + $0x5b0] sm:$0xf0]  ;;  %v4759_v37 = vld [vmem:[#allocation5 + $0x6a4] sm:$0xf]  ;;  %2069 = vmatmul.bf16.vlgmr.msra.gmra.mxu1 %v5464_v11  ;;  %v3844_v42 = vor.u32 %v4695_v32, %v3841_v33 }
  0xb9   : > { %2117 = vmatpush.bf16.msrb.mxu1 %v4004_v17  ;;  %v4097_v38 = vld [vmem:[#allocation5 + $0x6b0] sm:$0xf0]  ;;  %v4791_v39 = vld [vmem:[#allocation5 + $0x7a4] sm:$0xf]  ;;  %2083 = vmatmul.bf16.vlgmr.msra.gmra.mxu2 %v5457_v2  ;;  %v3972_v43 = vor.u32 %v4727_v34, %v3969_v36 }
  0xba   : > { %2131 = vmatpush.bf16.msrb.mxu2 %v4132_v19  ;;  %v4225_v41 = vld [vmem:[#allocation5 + $0x7b0] sm:$0xf0]  ;;  %2097 = vmatmul.bf16.vlgmr.msra.gmra.mxu3 %v5467_v18  ;;  %v4100_v46 = vor.u32 %v4759_v37, %v4097_v38  ;;  %v4691_v47 = vld [vmem:[#allocation5 + $0x484] sm:$0xf] }
  0xbb   : > { %2145 = vmatpush.bf16.msrb.mxu3 %v4260_v23  ;;  %v3825_v49 = vld [vmem:[#allocation5 + $0x490] sm:$0xf0]  ;;  %v4723_v50 = vld [vmem:[#allocation5 + $0x584] sm:$0xf]  ;;  %v4228_v51 = vor.u32 %v4791_v39, %v4225_v41 }
  0xbc   : > { %2104 = vmatpush.bf16.msrb.mxu0 %v3860_v29  ;;  %v3953_v52 = vld [vmem:[#allocation5 + $0x590] sm:$0xf0]  ;;  %v4755_v53 = vld [vmem:[#allocation5 + $0x684] sm:$0xf]  ;;  %v3828_v57 = vor.u32 %v4691_v47, %v3825_v49  ;;  %v3367_v49 = vld [vmem:[#allocation5 + $0xe8] sm:$0xf] }
  0xbd   : > { %2118 = vmatpush.bf16.msrb.mxu1 %v3988_v30  ;;  %v4081_v54 = vld [vmem:[#allocation5 + $0x690] sm:$0xf0]  ;;  %v4787_v55 = vld [vmem:[#allocation5 + $0x784] sm:$0xf]  ;;  %v3956_v58 = vor.u32 %v4723_v50, %v3953_v52  ;;  %v4578_v50 = vld [vmem:[#allocation5 + $0xf4] sm:$0xf0] }
  0xbe   : > { %2132 = vmatpush.bf16.msrb.mxu2 %v4116_v31  ;;  %v4209_v56 = vld [vmem:[#allocation5 + $0x790] sm:$0xf0]  ;;  %v4084_v60 = vor.u32 %v4755_v53, %v4081_v54  ;;  %v4687_v61 = vld [vmem:[#allocation5 + $0x464] sm:$0xf]  ;;  %v4610_v53 = vld [vmem:[#allocation5 + $0x1f4] sm:$0xf0] }
  0xbf   : > { %2146 = vmatpush.bf16.msrb.mxu3 %v4244_v35  ;;  %v3809_v62 = vld [vmem:[#allocation5 + $0x470] sm:$0xf0]  ;;  %v4719_v63 = vld [vmem:[#allocation5 + $0x564] sm:$0xf]  ;;  %v4212_v0 = vor.u32 %v4787_v55, %v4209_v56  ;;  %v3623_v54 = vld [vmem:[#allocation5 + $0x2e8] sm:$0xf] }
  0xc0   : > { %2105 = vmatpush.bf16.msrb.mxu0 %v3844_v42  ;;  %v3937_v1 = vld [vmem:[#allocation5 + $0x570] sm:$0xf0]  ;;  %v4751_v3 = vld [vmem:[#allocation5 + $0x664] sm:$0xf]  ;;  %v3812_v7 = vor.u32 %v4687_v61, %v3809_v62  ;;  %v4642_v55 = vld [vmem:[#allocation5 + $0x2f4] sm:$0xf0]  ;;  %v3368_v62 = vor.u32 %v4578_v50, %v3367_v49 }
  0xc1   : > { %2119 = vmatpush.bf16.msrb.mxu1 %v3972_v43  ;;  %v4065_v4 = vld [vmem:[#allocation5 + $0x670] sm:$0xf0]  ;;  %v4783_v5 = vld [vmem:[#allocation5 + $0x764] sm:$0xf]  ;;  %v3940_v8 = vor.u32 %v4719_v63, %v3937_v1  ;;  %v3351_v1 = vld [vmem:[#allocation5 + $0xc8] sm:$0xf] }
  0xc2   : > { %2133 = vmatpush.bf16.msrb.mxu2 %v4100_v46  ;;  %v4193_v6 = vld [vmem:[#allocation5 + $0x770] sm:$0xf0]  ;;  %v4068_v9 = vor.u32 %v4751_v3, %v4065_v4  ;;  %v4683_v10 = vld [vmem:[#allocation5 + $0x444] sm:$0xf]  ;;  %v4574_v3 = vld [vmem:[#allocation5 + $0xd4] sm:$0xf0] }
  0xc3   : > { %2147 = vmatpush.bf16.msrb.mxu3 %v4228_v51  ;;  %v3793_v12 = vld [vmem:[#allocation5 + $0x450] sm:$0xf0]  ;;  %v4715_v13 = vld [vmem:[#allocation5 + $0x544] sm:$0xf]  ;;  %v4196_v14 = vor.u32 %v4783_v5, %v4193_v6  ;;  %v3495_v51 = vld [vmem:[#allocation5 + $0x1e8] sm:$0xf] }
  0xc4   : > { %2106 = vmatpush.bf16.msrb.mxu0 %v3828_v57  ;;  %v3921_v15 = vld [vmem:[#allocation5 + $0x550] sm:$0xf0]  ;;  %v4747_v16 = vld [vmem:[#allocation5 + $0x644] sm:$0xf]  ;;  %v3796_v21 = vor.u32 %v4683_v10, %v3793_v12  ;;  %v3496_v63 = vor.u32 %v4610_v53, %v3495_v51  ;;  %v3479_v4 = vld [vmem:[#allocation5 + $0x1c8] sm:$0xf]  ;;  %v3352_v12 = vor.u32 %v4574_v3, %v3351_v1 }
  0xc5   : > { %2120 = vmatpush.bf16.msrb.mxu1 %v3956_v58  ;;  %v4049_v17 = vld [vmem:[#allocation5 + $0x650] sm:$0xf0]  ;;  %v4779_v19 = vld [vmem:[#allocation5 + $0x744] sm:$0xf]  ;;  %v3924_v22 = vor.u32 %v4715_v13, %v3921_v15  ;;  %v3751_v58 = vld [vmem:[#allocation5 + $0x3e8] sm:$0xf] }
  0xc6   : > { %2134 = vmatpush.bf16.msrb.mxu2 %v4084_v60  ;;  %v4177_v20 = vld [vmem:[#allocation5 + $0x750] sm:$0xf0]  ;;  %v4052_v23 = vor.u32 %v4747_v16, %v4049_v17  ;;  %v4679_v24 = vld [vmem:[#allocation5 + $0x424] sm:$0xf]  ;;  %v4674_v60 = vld [vmem:[#allocation5 + $0x3f4] sm:$0xf0] }
  0xc7   : > { %2148 = vmatpush.bf16.msrb.mxu3 %v4212_v0  ;;  %v3777_v25 = vld [vmem:[#allocation5 + $0x430] sm:$0xf0]  ;;  %v4711_v26 = vld [vmem:[#allocation5 + $0x524] sm:$0xf]  ;;  %v4180_v27 = vor.u32 %v4779_v19, %v4177_v20  ;;  %v3624_v0 = vor.u32 %v4642_v55, %v3623_v54  ;;  %v3752_v5 = vor.u32 %v4674_v60, %v3751_v58  ;;  %v4606_v6 = vld [vmem:[#allocation5 + $0x1d4] sm:$0xf0] }
  0xc8   : > { %2107 = vmatpush.bf16.msrb.mxu0 %v3812_v7  ;;  %v3905_v28 = vld [vmem:[#allocation5 + $0x530] sm:$0xf0]  ;;  %v4743_v29 = vld [vmem:[#allocation5 + $0x624] sm:$0xf]  ;;  %v3780_v33 = vor.u32 %v4679_v24, %v3777_v25  ;;  %v3607_v7 = vld [vmem:[#allocation5 + $0x2c8] sm:$0xf]  ;;  %v3480_v13 = vor.u32 %v4606_v6, %v3479_v4 }
  0xc9   : > { %2121 = vmatpush.bf16.msrb.mxu1 %v3940_v8  ;;  %v4033_v30 = vld [vmem:[#allocation5 + $0x630] sm:$0xf0]  ;;  %v4775_v31 = vld [vmem:[#allocation5 + $0x724] sm:$0xf]  ;;  %v3908_v36 = vor.u32 %v4711_v26, %v3905_v28  ;;  %v4638_v8 = vld [vmem:[#allocation5 + $0x2d4] sm:$0xf0] }
  0xca   : > { %2135 = vmatpush.bf16.msrb.mxu2 %v4068_v9  ;;  %v4161_v32 = vld [vmem:[#allocation5 + $0x730] sm:$0xf0]  ;;  %v4675_v34 = vld [vmem:[#allocation5 + $0x404] sm:$0xf]  ;;  %v4036_v37 = vor.u32 %v4743_v29, %v4033_v30  ;;  %v3735_v9 = vld [vmem:[#allocation5 + $0x3c8] sm:$0xf] }
  0xcb   : > { %2149 = vmatpush.bf16.msrb.mxu3 %v4196_v14  ;;  %v3761_v35 = vld [vmem:[#allocation5 + $0x410] sm:$0xf0]  ;;  %v4707_v38 = vld [vmem:[#allocation5 + $0x504] sm:$0xf]  ;;  %v4164_v42 = vor.u32 %v4775_v31, %v4161_v32  ;;  %v4670_v10 = vld [vmem:[#allocation5 + $0x3d4] sm:$0xf0]  ;;  %v3608_v14 = vor.u32 %v4638_v8, %v3607_v7 }
  0xcc   : > { %2108 = vmatpush.bf16.msrb.mxu0 %v3796_v21  ;;  %v3889_v39 = vld [vmem:[#allocation5 + $0x510] sm:$0xf0]  ;;  %v4739_v41 = vld [vmem:[#allocation5 + $0x604] sm:$0xf]  ;;  %v3764_v52 = vor.u32 %v4675_v34, %v3761_v35  ;;  %v3335_v15 = vld [vmem:[#allocation5 + $0xa8] sm:$0xf]  ;;  %v3736_v19 = vor.u32 %v4670_v10, %v3735_v9 }
  0xcd   : > { %2122 = vmatpush.bf16.msrb.mxu1 %v3924_v22  ;;  %v4017_v43 = vld [vmem:[#allocation5 + $0x610] sm:$0xf0]  ;;  %v4771_v46 = vld [vmem:[#allocation5 + $0x704] sm:$0xf]  ;;  %v3892_v56 = vor.u32 %v4707_v38, %v3889_v39  ;;  %v4570_v16 = vld [vmem:[#allocation5 + $0xb4] sm:$0xf0] }
  0xce   : > { %2136 = vmatpush.bf16.msrb.mxu2 %v4052_v23  ;;  %v4145_v47 = vld [vmem:[#allocation5 + $0x710] sm:$0xf0]  ;;  %v4020_v57 = vor.u32 %v4739_v41, %v4017_v43  ;;  %v3463_v17 = vld [vmem:[#allocation5 + $0x1a8] sm:$0xf]  ;;  %v4602_v20 = vld [vmem:[#allocation5 + $0x1b4] sm:$0xf0]  ;;  %v3336_v25 = vor.u32 %v4570_v16, %v3335_v15 }
  0xcf   : > { %2150 = vmatpush.bf16.msrb.mxu3 %v4180_v27  ;;  %v4148_v61 = vor.u32 %v4771_v46, %v4145_v47  ;;  %v3591_v21 = vld [vmem:[#allocation5 + $0x2a8] sm:$0xf]  ;;  %v4634_v22 = vld [vmem:[#allocation5 + $0x2b4] sm:$0xf0]  ;;  %v3464_v26 = vor.u32 %v4602_v20, %v3463_v17 }
  0xd0   : > { %2109 = vmatpush.bf16.msrb.mxu0 %v3780_v33  ;;  %v3719_v23 = vld [vmem:[#allocation5 + $0x3a8] sm:$0xf]  ;;  %v4666_v24 = vld [vmem:[#allocation5 + $0x3b4] sm:$0xf0]  ;;  %v3592_v27 = vor.u32 %v4634_v22, %v3591_v21 }
  0xd1   : > { %2123 = vmatpush.bf16.msrb.mxu1 %v3908_v36  ;;  %v3319_v28 = vld [vmem:[#allocation5 + $0x88] sm:$0xf]  ;;  %v4566_v29 = vld [vmem:[#allocation5 + $0x94] sm:$0xf0]  ;;  %v3720_v31 = vor.u32 %v4666_v24, %v3719_v23 }
  0xd2   : > { %2137 = vmatpush.bf16.msrb.mxu2 %v4036_v37  ;;  %v3447_v30 = vld [vmem:[#allocation5 + $0x188] sm:$0xf]  ;;  %v4598_v32 = vld [vmem:[#allocation5 + $0x194] sm:$0xf0]  ;;  %v3320_v37 = vor.u32 %v4566_v29, %v3319_v28 }
  0xd3   : > { %2151 = vmatpush.bf16.msrb.mxu3 %v4164_v42  ;;  %v3575_v33 = vld [vmem:[#allocation5 + $0x288] sm:$0xf]  ;;  %v4630_v34 = vld [vmem:[#allocation5 + $0x294] sm:$0xf0]  ;;  %v3448_v38 = vor.u32 %v4598_v32, %v3447_v30 }
  0xd4   : > { %2110 = vmatpush.bf16.msrb.mxu0 %v3764_v52  ;;  %v3703_v35 = vld [vmem:[#allocation5 + $0x388] sm:$0xf]  ;;  %v4662_v36 = vld [vmem:[#allocation5 + $0x394] sm:$0xf0]  ;;  %v3576_v39 = vor.u32 %v4630_v34, %v3575_v33 }
  0xd5   : > { %2124 = vmatpush.bf16.msrb.mxu1 %v3892_v56  ;;  %v3303_v41 = vld [vmem:[#allocation5 + $0x68] sm:$0xf]  ;;  %v4562_v42 = vld [vmem:[#allocation5 + $0x74] sm:$0xf0]  ;;  %v3704_v46 = vor.u32 %v4662_v36, %v3703_v35 }
  0xd6   : > { %2138 = vmatpush.bf16.msrb.mxu2 %v4020_v57  ;;  %v3431_v43 = vld [vmem:[#allocation5 + $0x168] sm:$0xf]  ;;  %v4594_v47 = vld [vmem:[#allocation5 + $0x174] sm:$0xf0]  ;;  %v3304_v53 = vor.u32 %v4562_v42, %v3303_v41 }
  0xd7   : > { %2152 = vmatpush.bf16.msrb.mxu3 %v4148_v61  ;;  %2111 = vmatmul.bf16.vlgmr.msrb.gmra.mxu0 %v5479_v40  ;;  %v3559_v49 = vld [vmem:[#allocation5 + $0x268] sm:$0xf]  ;;  %v4626_v50 = vld [vmem:[#allocation5 + $0x274] sm:$0xf0]  ;;  %v3432_v54 = vor.u32 %v4594_v47, %v3431_v43 }
  0xd8   : > { %2159 = vmatpush.bf16.msra.mxu0 %v3368_v62  ;;  %2125 = vmatmul.bf16.vlgmr.msrb.gmra.mxu1 %v5483_v45  ;;  %v3687_v51 = vld [vmem:[#allocation5 + $0x368] sm:$0xf]  ;;  %v4658_v52 = vld [vmem:[#allocation5 + $0x374] sm:$0xf0]  ;;  %v3560_v55 = vor.u32 %v4626_v50, %v3559_v49 }
  0xd9   : > { %2173 = vmatpush.bf16.msra.mxu1 %v3496_v63  ;;  %2139 = vmatmul.bf16.vlgmr.msrb.gmra.mxu2 %v5481_v44  ;;  %v3287_v56 = vld [vmem:[#allocation5 + $0x48] sm:$0xf]  ;;  %v4558_v57 = vld [vmem:[#allocation5 + $0x54] sm:$0xf0]  ;;  %v3688_v60 = vor.u32 %v4658_v52, %v3687_v51 }
  0xda   : > { %2187 = vmatpush.bf16.msra.mxu2 %v3624_v0  ;;  %2153 = vmatmul.bf16.vlgmr.msrb.gmra.mxu3 %v5485_v48  ;;  %v3415_v58 = vld [vmem:[#allocation5 + $0x148] sm:$0xf]  ;;  %v4590_v61 = vld [vmem:[#allocation5 + $0x154] sm:$0xf0]  ;;  %v3288_v3 = vor.u32 %v4558_v57, %v3287_v56 }
  0xdb   : > { %2201 = vmatpush.bf16.msra.mxu3 %v3752_v5  ;;  %v3543_v62 = vld [vmem:[#allocation5 + $0x248] sm:$0xf]  ;;  %v4622_v63 = vld [vmem:[#allocation5 + $0x254] sm:$0xf0]  ;;  %v3416_v4 = vor.u32 %v4590_v61, %v3415_v58 }
  0xdc   : > { %2160 = vmatpush.bf16.msra.mxu0 %v3352_v12  ;;  %v3671_v0 = vld [vmem:[#allocation5 + $0x348] sm:$0xf]  ;;  %v4654_v1 = vld [vmem:[#allocation5 + $0x354] sm:$0xf0]  ;;  %v3544_v5 = vor.u32 %v4622_v63, %v3543_v62 }
  0xdd   : > { %2174 = vmatpush.bf16.msra.mxu1 %v3480_v13  ;;  %v3271_v6 = vld [vmem:[#allocation5 + $0x28] sm:$0xf]  ;;  %v4554_v7 = vld [vmem:[#allocation5 + $0x34] sm:$0xf0]  ;;  %v3672_v9 = vor.u32 %v4654_v1, %v3671_v0 }
  0xde   : > { %2188 = vmatpush.bf16.msra.mxu2 %v3608_v14  ;;  %v3399_v8 = vld [vmem:[#allocation5 + $0x128] sm:$0xf]  ;;  %v4586_v10 = vld [vmem:[#allocation5 + $0x134] sm:$0xf0]  ;;  %v3272_v16 = vor.u32 %v4554_v7, %v3271_v6 }
  0xdf   : > { %2202 = vmatpush.bf16.msra.mxu3 %v3736_v19  ;;  %v3527_v12 = vld [vmem:[#allocation5 + $0x228] sm:$0xf]  ;;  %v4618_v13 = vld [vmem:[#allocation5 + $0x234] sm:$0xf0]  ;;  %v3400_v20 = vor.u32 %v4586_v10, %v3399_v8 }
  0xe0   : > { %2161 = vmatpush.bf16.msra.mxu0 %v3336_v25  ;;  %v3655_v14 = vld [vmem:[#allocation5 + $0x328] sm:$0xf]  ;;  %v4650_v15 = vld [vmem:[#allocation5 + $0x334] sm:$0xf0]  ;;  %v3528_v21 = vor.u32 %v4618_v13, %v3527_v12 }
  0xe1   : > { %2175 = vmatpush.bf16.msra.mxu1 %v3464_v26  ;;  %v3255_v17 = vld [vmem:[#allocation5 + $0x8] sm:$0xf]  ;;  %v4550_v19 = vld [vmem:[#allocation5 + $0x14] sm:$0xf0]  ;;  %v3656_v25 = vor.u32 %v4650_v15, %v3655_v14 }
  0xe2   : > { %2189 = vmatpush.bf16.msra.mxu2 %v3592_v27  ;;  %v3383_v22 = vld [vmem:[#allocation5 + $0x108] sm:$0xf]  ;;  %v4582_v23 = vld [vmem:[#allocation5 + $0x114] sm:$0xf0]  ;;  %v3256_v32 = vor.u32 %v4550_v19, %v3255_v17 }
  0xe3   : > { %2203 = vmatpush.bf16.msra.mxu3 %v3720_v31  ;;  %v3511_v24 = vld [vmem:[#allocation5 + $0x208] sm:$0xf]  ;;  %v4614_v26 = vld [vmem:[#allocation5 + $0x214] sm:$0xf0]  ;;  %v3384_v36 = vor.u32 %v4582_v23, %v3383_v22 }
  0xe4   : > { %2162 = vmatpush.bf16.msra.mxu0 %v3320_v37  ;;  %v3639_v27 = vld [vmem:[#allocation5 + $0x308] sm:$0xf]  ;;  %v4646_v28 = vld [vmem:[#allocation5 + $0x314] sm:$0xf0]  ;;  %v3512_v37 = vor.u32 %v4614_v26, %v3511_v24 }
  0xe5   : > { %2176 = vmatpush.bf16.msra.mxu1 %v3448_v38  ;;  %v3879_v29 = vld [vmem:[#allocation5 + $0x4e8] sm:$0xf]  ;;  %v4706_v30 = vld [vmem:[#allocation5 + $0x4f4] sm:$0xf0]  ;;  %v3640_v41 = vor.u32 %v4646_v28, %v3639_v27 }
  0xe6   : > { %2190 = vmatpush.bf16.msra.mxu2 %v3576_v39  ;;  %v4007_v31 = vld [vmem:[#allocation5 + $0x5e8] sm:$0xf]  ;;  %v4738_v33 = vld [vmem:[#allocation5 + $0x5f4] sm:$0xf0]  ;;  %v3880_v42 = vor.u32 %v4706_v30, %v3879_v29 }
  0xe7   : > { %2204 = vmatpush.bf16.msra.mxu3 %v3704_v46  ;;  %v4135_v34 = vld [vmem:[#allocation5 + $0x6e8] sm:$0xf]  ;;  %v4770_v35 = vld [vmem:[#allocation5 + $0x6f4] sm:$0xf0]  ;;  %v4008_v43 = vor.u32 %v4738_v33, %v4007_v31 }
  0xe8   : > { %2163 = vmatpush.bf16.msra.mxu0 %v3304_v53  ;;  %v4263_v38 = vld [vmem:[#allocation5 + $0x7e8] sm:$0xf]  ;;  %v4802_v39 = vld [vmem:[#allocation5 + $0x7f4] sm:$0xf0]  ;;  %v4136_v46 = vor.u32 %v4770_v35, %v4135_v34 }
  0xe9   : > { %2177 = vmatpush.bf16.msra.mxu1 %v3432_v54  ;;  %v3863_v47 = vld [vmem:[#allocation5 + $0x4c8] sm:$0xf]  ;;  %v4702_v49 = vld [vmem:[#allocation5 + $0x4d4] sm:$0xf0]  ;;  %v4264_v51 = vor.u32 %v4802_v39, %v4263_v38 }
  0xea   : > { %2191 = vmatpush.bf16.msra.mxu2 %v3560_v55  ;;  %v3991_v50 = vld [vmem:[#allocation5 + $0x5c8] sm:$0xf]  ;;  %v4734_v52 = vld [vmem:[#allocation5 + $0x5d4] sm:$0xf0]  ;;  %v3864_v57 = vor.u32 %v4702_v49, %v3863_v47 }
  0xeb   : > { %2205 = vmatpush.bf16.msra.mxu3 %v3688_v60  ;;  %v4119_v53 = vld [vmem:[#allocation5 + $0x6c8] sm:$0xf]  ;;  %v4766_v54 = vld [vmem:[#allocation5 + $0x6d4] sm:$0xf0]  ;;  %v3992_v58 = vor.u32 %v4734_v52, %v3991_v50 }
  0xec   : > { %2164 = vmatpush.bf16.msra.mxu0 %v3288_v3  ;;  %v4247_v55 = vld [vmem:[#allocation5 + $0x7c8] sm:$0xf]  ;;  %v4798_v56 = vld [vmem:[#allocation5 + $0x7d4] sm:$0xf0]  ;;  %v4120_v60 = vor.u32 %v4766_v54, %v4119_v53 }
  0xed   : > { %2178 = vmatpush.bf16.msra.mxu1 %v3416_v4  ;;  %v3847_v61 = vld [vmem:[#allocation5 + $0x4a8] sm:$0xf]  ;;  %v4698_v62 = vld [vmem:[#allocation5 + $0x4b4] sm:$0xf0]  ;;  %v4248_v0 = vor.u32 %v4798_v56, %v4247_v55 }
  0xee   : > { %2192 = vmatpush.bf16.msra.mxu2 %v3544_v5  ;;  %v3975_v63 = vld [vmem:[#allocation5 + $0x5a8] sm:$0xf]  ;;  %v4730_v1 = vld [vmem:[#allocation5 + $0x5b4] sm:$0xf0]  ;;  %v3848_v7 = vor.u32 %v4698_v62, %v3847_v61 }
  0xef   : > { %2206 = vmatpush.bf16.msra.mxu3 %v3672_v9  ;;  %v4103_v3 = vld [vmem:[#allocation5 + $0x6a8] sm:$0xf]  ;;  %v4762_v4 = vld [vmem:[#allocation5 + $0x6b4] sm:$0xf0]  ;;  %v3976_v8 = vor.u32 %v4730_v1, %v3975_v63 }
  0xf0   : > { %2165 = vmatpush.bf16.msra.mxu0 %v3272_v16  ;;  %v4231_v5 = vld [vmem:[#allocation5 + $0x7a8] sm:$0xf]  ;;  %v4794_v6 = vld [vmem:[#allocation5 + $0x7b4] sm:$0xf0]  ;;  %v4104_v9 = vor.u32 %v4762_v4, %v4103_v3 }
  0xf1   : > { %2179 = vmatpush.bf16.msra.mxu1 %v3400_v20  ;;  %v3831_v10 = vld [vmem:[#allocation5 + $0x488] sm:$0xf]  ;;  %v4694_v12 = vld [vmem:[#allocation5 + $0x494] sm:$0xf0]  ;;  %v4232_v14 = vor.u32 %v4794_v6, %v4231_v5 }
  0xf2   : > { %2193 = vmatpush.bf16.msra.mxu2 %v3528_v21  ;;  %v3959_v13 = vld [vmem:[#allocation5 + $0x588] sm:$0xf]  ;;  %v4726_v15 = vld [vmem:[#allocation5 + $0x594] sm:$0xf0]  ;;  %v3832_v21 = vor.u32 %v4694_v12, %v3831_v10  ;;  %v4576_v12 = vld [vmem:[#allocation5 + $0xec] sm:$0xf] }
  0xf3   : > { %2207 = vmatpush.bf16.msra.mxu3 %v3656_v25  ;;  %v4087_v16 = vld [vmem:[#allocation5 + $0x688] sm:$0xf]  ;;  %v4758_v17 = vld [vmem:[#allocation5 + $0x694] sm:$0xf0]  ;;  %v3960_v22 = vor.u32 %v4726_v15, %v3959_v13  ;;  %v3369_v13 = vld [vmem:[#allocation5 + $0xf8] sm:$0xf0] }
  0xf4   : > { %2166 = vmatpush.bf16.msra.mxu0 %v3256_v32  ;;  %v4215_v19 = vld [vmem:[#allocation5 + $0x788] sm:$0xf]  ;;  %v4790_v20 = vld [vmem:[#allocation5 + $0x794] sm:$0xf0]  ;;  %v4088_v23 = vor.u32 %v4758_v17, %v4087_v16  ;;  %v3497_v16 = vld [vmem:[#allocation5 + $0x1f8] sm:$0xf0] }
  0xf5   : > { %2180 = vmatpush.bf16.msra.mxu1 %v3384_v36  ;;  %v3815_v24 = vld [vmem:[#allocation5 + $0x468] sm:$0xf]  ;;  %v4690_v25 = vld [vmem:[#allocation5 + $0x474] sm:$0xf0]  ;;  %v4216_v27 = vor.u32 %v4790_v20, %v4215_v19  ;;  %v4640_v17 = vld [vmem:[#allocation5 + $0x2ec] sm:$0xf] }
  0xf6   : > { %2194 = vmatpush.bf16.msra.mxu2 %v3512_v37  ;;  %v3943_v26 = vld [vmem:[#allocation5 + $0x568] sm:$0xf]  ;;  %v4722_v28 = vld [vmem:[#allocation5 + $0x574] sm:$0xf0]  ;;  %v3816_v33 = vor.u32 %v4690_v25, %v3815_v24  ;;  %v3625_v19 = vld [vmem:[#allocation5 + $0x2f8] sm:$0xf0]  ;;  %v3372_v25 = vor.u32 %v4576_v12, %v3369_v13 }
  0xf7   : > { %2208 = vmatpush.bf16.msra.mxu3 %v3640_v41  ;;  %2167 = vmatmul.bf16.vlgmr.msra.gmra.mxu0 %v5454_v59  ;;  %v4071_v29 = vld [vmem:[#allocation5 + $0x668] sm:$0xf]  ;;  %v4754_v30 = vld [vmem:[#allocation5 + $0x674] sm:$0xf0]  ;;  %v3944_v34 = vor.u32 %v4722_v28, %v3943_v26  ;;  %v4572_v28 = vld [vmem:[#allocation5 + $0xcc] sm:$0xf] }
  0xf8   : > { %2215 = vmatpush.bf16.msrb.mxu0 %v3880_v42  ;;  %2181 = vmatmul.bf16.vlgmr.msra.gmra.mxu1 %v5464_v11  ;;  %v4199_v31 = vld [vmem:[#allocation5 + $0x768] sm:$0xf]  ;;  %v4786_v32 = vld [vmem:[#allocation5 + $0x774] sm:$0xf0]  ;;  %v4072_v35 = vor.u32 %v4754_v30, %v4071_v29  ;;  %v3353_v29 = vld [vmem:[#allocation5 + $0xd8] sm:$0xf0] }
  0xf9   : > { %2229 = vmatpush.bf16.msrb.mxu1 %v4008_v43  ;;  %2195 = vmatmul.bf16.vlgmr.msra.gmra.mxu2 %v5457_v2  ;;  %v3799_v36 = vld [vmem:[#allocation5 + $0x448] sm:$0xf]  ;;  %v4686_v37 = vld [vmem:[#allocation5 + $0x454] sm:$0xf0]  ;;  %v4200_v39 = vor.u32 %v4786_v32, %v4199_v31  ;;  %v4604_v30 = vld [vmem:[#allocation5 + $0x1cc] sm:$0xf] }
  0xfa   : > { %2243 = vmatpush.bf16.msrb.mxu2 %v4136_v46  ;;  %2209 = vmatmul.bf16.vlgmr.msra.gmra.mxu3 %v5467_v18  ;;  %v3927_v38 = vld [vmem:[#allocation5 + $0x548] sm:$0xf]  ;;  %v4718_v41 = vld [vmem:[#allocation5 + $0x554] sm:$0xf0]  ;;  %v3800_v49 = vor.u32 %v4686_v37, %v3799_v36  ;;  %v3481_v32 = vld [vmem:[#allocation5 + $0x1d8] sm:$0xf0]  ;;  %v3356_v37 = vor.u32 %v4572_v28, %v3353_v29 }
  0xfb   : > { %2257 = vmatpush.bf16.msrb.mxu3 %v4264_v51  ;;  %v4055_v42 = vld [vmem:[#allocation5 + $0x648] sm:$0xf]  ;;  %v4750_v43 = vld [vmem:[#allocation5 + $0x654] sm:$0xf0]  ;;  %v3928_v50 = vor.u32 %v4718_v41, %v3927_v38  ;;  %v3737_v36 = vld [vmem:[#allocation5 + $0x3d8] sm:$0xf0]  ;;  %v3484_v38 = vor.u32 %v4604_v30, %v3481_v32 }
  0xfc   : > { %2216 = vmatpush.bf16.msrb.mxu0 %v3864_v57  ;;  %v4183_v46 = vld [vmem:[#allocation5 + $0x748] sm:$0xf]  ;;  %v4782_v47 = vld [vmem:[#allocation5 + $0x754] sm:$0xf0]  ;;  %v4056_v51 = vor.u32 %v4750_v43, %v4055_v42  ;;  %v4568_v41 = vld [vmem:[#allocation5 + $0xac] sm:$0xf] }
  0xfd   : > { %2230 = vmatpush.bf16.msrb.mxu1 %v3992_v58  ;;  %v3783_v52 = vld [vmem:[#allocation5 + $0x428] sm:$0xf]  ;;  %v4682_v53 = vld [vmem:[#allocation5 + $0x434] sm:$0xf0]  ;;  %v4184_v55 = vor.u32 %v4782_v47, %v4183_v46  ;;  %v3337_v42 = vld [vmem:[#allocation5 + $0xb8] sm:$0xf0] }
  0xfe   : > { %2244 = vmatpush.bf16.msrb.mxu2 %v4120_v60  ;;  %v3911_v54 = vld [vmem:[#allocation5 + $0x528] sm:$0xf]  ;;  %v4714_v56 = vld [vmem:[#allocation5 + $0x534] sm:$0xf0]  ;;  %v3784_v62 = vor.u32 %v4682_v53, %v3783_v52  ;;  %v4600_v43 = vld [vmem:[#allocation5 + $0x1ac] sm:$0xf]  ;;  %v3340_v53 = vor.u32 %v4568_v41, %v3337_v42 }
  0xff   : > { %2258 = vmatpush.bf16.msrb.mxu3 %v4248_v0  ;;  %v4039_v57 = vld [vmem:[#allocation5 + $0x628] sm:$0xf]  ;;  %v4746_v58 = vld [vmem:[#allocation5 + $0x634] sm:$0xf0]  ;;  %v3912_v1 = vor.u32 %v4714_v56, %v3911_v54  ;;  %v3465_v47 = vld [vmem:[#allocation5 + $0x1b8] sm:$0xf0] }
 0x100   : > { %2217 = vmatpush.bf16.msrb.mxu0 %v3848_v7  ;;  %v4167_v60 = vld [vmem:[#allocation5 + $0x728] sm:$0xf]  ;;  %v4778_v61 = vld [vmem:[#allocation5 + $0x734] sm:$0xf0]  ;;  %v4040_v3 = vor.u32 %v4746_v58, %v4039_v57  ;;  %v3721_v52 = vld [vmem:[#allocation5 + $0x3b8] sm:$0xf0]  ;;  %v3468_v54 = vor.u32 %v4600_v43, %v3465_v47 }
 0x101   : > { %2231 = vmatpush.bf16.msrb.mxu1 %v3976_v8  ;;  %v3767_v63 = vld [vmem:[#allocation5 + $0x408] sm:$0xf]  ;;  %v4678_v0 = vld [vmem:[#allocation5 + $0x414] sm:$0xf0]  ;;  %v4168_v7 = vor.u32 %v4778_v61, %v4167_v60  ;;  %v4564_v56 = vld [vmem:[#allocation5 + $0x8c] sm:$0xf] }
 0x102   : > { %2245 = vmatpush.bf16.msrb.mxu2 %v4104_v9  ;;  %v3895_v4 = vld [vmem:[#allocation5 + $0x508] sm:$0xf]  ;;  %v4710_v5 = vld [vmem:[#allocation5 + $0x514] sm:$0xf0]  ;;  %v3768_v15 = vor.u32 %v4678_v0, %v3767_v63  ;;  %v3321_v57 = vld [vmem:[#allocation5 + $0x98] sm:$0xf0] }
 0x103   : > { %2259 = vmatpush.bf16.msrb.mxu3 %v4232_v14  ;;  %v4023_v6 = vld [vmem:[#allocation5 + $0x608] sm:$0xf]  ;;  %v4742_v8 = vld [vmem:[#allocation5 + $0x614] sm:$0xf0]  ;;  %v4608_v14 = vld [vmem:[#allocation5 + $0x1ec] sm:$0xf]  ;;  %v3896_v20 = vor.u32 %v4710_v5, %v3895_v4  ;;  %v5507_v4 = vpop.f32.mrf.mxu0 }
 0x104   : > { %2218 = vmatpush.bf16.msrb.mxu0 %v3832_v21  ;;  %v4151_v9 = vld [vmem:[#allocation5 + $0x708] sm:$0xf]  ;;  %v4774_v10 = vld [vmem:[#allocation5 + $0x714] sm:$0xf0]  ;;  %v4024_v21 = vor.u32 %v4742_v8, %v4023_v6  ;;  %v3500_v26 = vor.u32 %v4608_v14, %v3497_v16  ;;  %v4596_v58 = vld [vmem:[#allocation5 + $0x18c] sm:$0xf] }
 0x105   : > { %2232 = vmatpush.bf16.msrb.mxu1 %v3960_v22  ;;  %v4672_v22 = vld [vmem:[#allocation5 + $0x3ec] sm:$0xf]  ;;  %v4152_v24 = vor.u32 %v4774_v10, %v4151_v9  ;;  %v3449_v61 = vld [vmem:[#allocation5 + $0x198] sm:$0xf0]  ;;  %v5509_v10 = vpop.f32.mrf.mxu1 }
 0x106   : > { %2246 = vmatpush.bf16.msrb.mxu2 %v4088_v23  ;;  %v3753_v23 = vld [vmem:[#allocation5 + $0x3f8] sm:$0xf0]  ;;  %v4660_v0 = vld [vmem:[#allocation5 + $0x38c] sm:$0xf]  ;;  %v3452_v5 = vor.u32 %v4596_v58, %v3449_v61 }
 0x107   : > { %2260 = vmatpush.bf16.msrb.mxu3 %v4216_v27  ;;  %v3628_v27 = vor.u32 %v4640_v17, %v3625_v19  ;;  %v3756_v31 = vor.u32 %v4672_v22, %v3753_v23  ;;  %v3577_v63 = vld [vmem:[#allocation5 + $0x298] sm:$0xf0]  ;;  %v4592_v9 = vld [vmem:[#allocation5 + $0x16c] sm:$0xf] }
 0x108   : > { %2219 = vmatpush.bf16.msrb.mxu0 %v3816_v33  ;;  %v4636_v33 = vld [vmem:[#allocation5 + $0x2cc] sm:$0xf]  ;;  %v3305_v8 = vld [vmem:[#allocation5 + $0x78] sm:$0xf0] }
 0x109   : > { %2233 = vmatpush.bf16.msrb.mxu1 %v3944_v34  ;;  %v3609_v34 = vld [vmem:[#allocation5 + $0x2d8] sm:$0xf0]  ;;  %v4624_v14 = vld [vmem:[#allocation5 + $0x26c] sm:$0xf] }
 0x10a   : > { %2247 = vmatpush.bf16.msrb.mxu2 %v4072_v35  ;;  %v4668_v35 = vld [vmem:[#allocation5 + $0x3cc] sm:$0xf]  ;;  %v3433_v13 = vld [vmem:[#allocation5 + $0x178] sm:$0xf0] }
 0x10b   : > { %2261 = vmatpush.bf16.msrb.mxu3 %v4200_v39  ;;  %v3612_v39 = vor.u32 %v4636_v33, %v3609_v34  ;;  %v3740_v46 = vor.u32 %v4668_v35, %v3737_v36  ;;  %v4656_v16 = vld [vmem:[#allocation5 + $0x36c] sm:$0xf]  ;;  %v3689_v17 = vld [vmem:[#allocation5 + $0x378] sm:$0xf0]  ;;  %v5513_v33 = vpop.f32.mrf.mxu3 }
 0x10c   : > { %2220 = vmatpush.bf16.msrb.mxu0 %v3800_v49  ;;  %v4632_v49 = vld [vmem:[#allocation5 + $0x2ac] sm:$0xf]  ;;  %v3289_v23 = vld [vmem:[#allocation5 + $0x58] sm:$0xf0] }
 0x10d   : > { %2234 = vmatpush.bf16.msrb.mxu1 %v3928_v50  ;;  %v3593_v50 = vld [vmem:[#allocation5 + $0x2b8] sm:$0xf0]  ;;  %v4556_v22 = vld [vmem:[#allocation5 + $0x4c] sm:$0xf] }
 0x10e   : > { %2248 = vmatpush.bf16.msrb.mxu2 %v4056_v51  ;;  %v4664_v51 = vld [vmem:[#allocation5 + $0x3ac] sm:$0xf]  ;;  %v3545_v28 = vld [vmem:[#allocation5 + $0x258] sm:$0xf0]  ;;  %v3292_v32 = vor.u32 %v4556_v22, %v3289_v23 }
 0x10f   : > { %2262 = vmatpush.bf16.msrb.mxu3 %v4184_v55  ;;  %v3596_v55 = vor.u32 %v4632_v49, %v3593_v50  ;;  %v3724_v60 = vor.u32 %v4664_v51, %v3721_v52  ;;  %v4652_v29 = vld [vmem:[#allocation5 + $0x34c] sm:$0xf]  ;;  %v3673_v30 = vld [vmem:[#allocation5 + $0x358] sm:$0xf0]  ;;  %v5517_v50 = vpop.f32.mrf.mxu1 }
 0x110   : > { %2221 = vmatpush.bf16.msrb.mxu0 %v3784_v62  ;;  %v4628_v62 = vld [vmem:[#allocation5 + $0x28c] sm:$0xf]  ;;  %v3401_v41 = vld [vmem:[#allocation5 + $0x138] sm:$0xf0] }
 0x111   : > { %2235 = vmatpush.bf16.msrb.mxu1 %v3912_v1  ;;  %v3705_v1 = vld [vmem:[#allocation5 + $0x398] sm:$0xf0]  ;;  %v3580_v6 = vor.u32 %v4628_v62, %v3577_v63  ;;  %v4552_v36 = vld [vmem:[#allocation5 + $0x2c] sm:$0xf] }
 0x112   : > { %2249 = vmatpush.bf16.msrb.mxu2 %v4040_v3  ;;  %v3324_v3 = vor.u32 %v4564_v56, %v3321_v57  ;;  %v3708_v12 = vor.u32 %v4660_v0, %v3705_v1  ;;  %v4616_v42 = vld [vmem:[#allocation5 + $0x22c] sm:$0xf]  ;;  %v3529_v43 = vld [vmem:[#allocation5 + $0x238] sm:$0xf0] }
 0x113   : > { %2263 = vmatpush.bf16.msrb.mxu3 %v4168_v7  ;;  %v4560_v7 = vld [vmem:[#allocation5 + $0x6c] sm:$0xf]  ;;  %v3657_v49 = vld [vmem:[#allocation5 + $0x338] sm:$0xf0] }
 0x114   : > { %2222 = vmatpush.bf16.msrb.mxu0 %v3768_v15  ;;  %v3561_v15 = vld [vmem:[#allocation5 + $0x278] sm:$0xf0]  ;;  %v3308_v19 = vor.u32 %v4560_v7, %v3305_v8  ;;  %v4648_v47 = vld [vmem:[#allocation5 + $0x32c] sm:$0xf] }
 0x115   : > { %2236 = vmatpush.bf16.msrb.mxu1 %v3896_v20  ;;  %v3436_v20 = vor.u32 %v4592_v9, %v3433_v13  ;;  %v4548_v52 = vld [vmem:[#allocation5 + $0xc] sm:$0xf]  ;;  %v3385_v57 = vld [vmem:[#allocation5 + $0x118] sm:$0xf0] }
 0x116   : > { %2250 = vmatpush.bf16.msrb.mxu2 %v4024_v21  ;;  %v3564_v21 = vor.u32 %v4624_v14, %v3561_v15  ;;  %v4580_v56 = vld [vmem:[#allocation5 + $0x10c] sm:$0xf]  ;;  %v3513_v61 = vld [vmem:[#allocation5 + $0x218] sm:$0xf0] }
 0x117   : > { %2264 = vmatpush.bf16.msrb.mxu3 %v4152_v24  ;;  %2223 = vmatmul.bf16.vlgmr.msrb.gmra.mxu0 %v5479_v40  ;;  %v4588_v24 = vld [vmem:[#allocation5 + $0x14c] sm:$0xf]  ;;  %v3641_v63 = vld [vmem:[#allocation5 + $0x318] sm:$0xf0]  ;;  %v3388_v9 = vor.u32 %v4580_v56, %v3385_v57 }
 0x118   : > { %2271 = vmatpush.bf16.msra.mxu0 %v3372_v25  ;;  %2237 = vmatmul.bf16.vlgmr.msrb.gmra.mxu1 %v5483_v45  ;;  %v3692_v25 = vor.u32 %v4656_v16, %v3689_v17  ;;  %v4612_v58 = vld [vmem:[#allocation5 + $0x20c] sm:$0xf]  ;;  %v3881_v1 = vld [vmem:[#allocation5 + $0x4f8] sm:$0xf0] }
 0x119   : > { %2285 = vmatpush.bf16.msra.mxu1 %v3500_v26  ;;  %2251 = vmatmul.bf16.vlgmr.msrb.gmra.mxu2 %v5481_v44  ;;  %v3417_v26 = vld [vmem:[#allocation5 + $0x158] sm:$0xf0]  ;;  %v4644_v62 = vld [vmem:[#allocation5 + $0x30c] sm:$0xf] }
 0x11a   : > { %2299 = vmatpush.bf16.msra.mxu2 %v3628_v27  ;;  %2265 = vmatmul.bf16.vlgmr.msrb.gmra.mxu3 %v5485_v48  ;;  %v4620_v27 = vld [vmem:[#allocation5 + $0x24c] sm:$0xf]  ;;  %v3420_v34 = vor.u32 %v4588_v24, %v3417_v26  ;;  %v4137_v8 = vld [vmem:[#allocation5 + $0x6f8] sm:$0xf0]  ;;  %v3644_v16 = vor.u32 %v4644_v62, %v3641_v63 }
 0x11b   : > { %2313 = vmatpush.bf16.msra.mxu3 %v3756_v31  ;;  %v5511_v31 = vpop.f32.mrf.mxu2  ;;  %v3548_v35 = vor.u32 %v4620_v27, %v3545_v28  ;;  %v4704_v0 = vld [vmem:[#allocation5 + $0x4ec] sm:$0xf]  ;;  %v4265_v14 = vld [vmem:[#allocation5 + $0x7f8] sm:$0xf0] }
 0x11c   : > { %2272 = vmatpush.bf16.msra.mxu0 %v3356_v37  ;;  %v3273_v37 = vld [vmem:[#allocation5 + $0x38] sm:$0xf0]  ;;  %v4768_v7 = vld [vmem:[#allocation5 + $0x6ec] sm:$0xf]  ;;  %v3884_v17 = vor.u32 %v4704_v0, %v3881_v1 }
 0x11d   : > { %2286 = vmatpush.bf16.msra.mxu1 %v3484_v38  ;;  %v4584_v38 = vld [vmem:[#allocation5 + $0x12c] sm:$0xf]  ;;  %v3276_v51 = vor.u32 %v4552_v36, %v3273_v37  ;;  %v3865_v23 = vld [vmem:[#allocation5 + $0x4d8] sm:$0xf0] }
 0x11e   : > { %2300 = vmatpush.bf16.msra.mxu2 %v3612_v39  ;;  %v3676_v39 = vor.u32 %v4652_v29, %v3673_v30  ;;  %v4800_v13 = vld [vmem:[#allocation5 + $0x7ec] sm:$0xf]  ;;  %v3993_v26 = vld [vmem:[#allocation5 + $0x5d8] sm:$0xf0] }
 0x11f   : > { %2314 = vmatpush.bf16.msra.mxu3 %v3740_v46  ;;  %v5515_v46 = vpop.f32.mrf.mxu0  ;;  %v4700_v22 = vld [vmem:[#allocation5 + $0x4cc] sm:$0xf]  ;;  %v4121_v28 = vld [vmem:[#allocation5 + $0x6d8] sm:$0xf0] }
 0x120   : > { %2273 = vmatpush.bf16.msra.mxu0 %v3340_v53  ;;  %v3257_v53 = vld [vmem:[#allocation5 + $0x18] sm:$0xf0]  ;;  %v4732_v24 = vld [vmem:[#allocation5 + $0x5cc] sm:$0xf] }
 0x121   : > { %2287 = vmatpush.bf16.msra.mxu1 %v3468_v54  ;;  %v3404_v54 = vor.u32 %v4584_v38, %v3401_v41  ;;  %v4764_v27 = vld [vmem:[#allocation5 + $0x6cc] sm:$0xf]  ;;  %v3996_v36 = vor.u32 %v4732_v24, %v3993_v26  ;;  %v3833_v57 = vld [vmem:[#allocation5 + $0x498] sm:$0xf0] }
 0x122   : > { %2301 = vmatpush.bf16.msra.mxu2 %v3596_v55  ;;  %v3532_v55 = vor.u32 %v4616_v42, %v3529_v43  ;;  %v4796_v30 = vld [vmem:[#allocation5 + $0x7cc] sm:$0xf]  ;;  %v4124_v37 = vor.u32 %v4764_v27, %v4121_v28  ;;  %v3977_v43 = vld [vmem:[#allocation5 + $0x5b8] sm:$0xf0] }
 0x123   : > { %2315 = vmatpush.bf16.msra.mxu3 %v3724_v60  ;;  %v3660_v60 = vor.u32 %v4648_v47, %v3657_v49  ;;  %v5519_v15 = vpop.f32.mrf.mxu2  ;;  %v4696_v38 = vld [vmem:[#allocation5 + $0x4ac] sm:$0xf]  ;;  %v4105_v49 = vld [vmem:[#allocation5 + $0x6b8] sm:$0xf0] }
 0x124   : > { %2274 = vmatpush.bf16.msra.mxu0 %v3324_v3  ;;  %v4736_v3 = vld [vmem:[#allocation5 + $0x5ec] sm:$0xf]  ;;  %v4217_v0 = vld [vmem:[#allocation5 + $0x798] sm:$0xf0] }
 0x125   : > { %2288 = vmatpush.bf16.msra.mxu1 %v3452_v5  ;;  %v3260_v5 = vor.u32 %v4548_v52, %v3257_v53  ;;  %v4728_v41 = vld [vmem:[#allocation5 + $0x5ac] sm:$0xf]  ;;  %v4233_v52 = vld [vmem:[#allocation5 + $0x7b8] sm:$0xf0] }
 0x126   : > { %2302 = vmatpush.bf16.msra.mxu2 %v3580_v6  ;;  %v4009_v6 = vld [vmem:[#allocation5 + $0x5f8] sm:$0xf0]  ;;  %v4760_v47 = vld [vmem:[#allocation5 + $0x6ac] sm:$0xf] }
 0x127   : > { %2316 = vmatpush.bf16.msra.mxu3 %v3708_v12  ;;  %v3516_v12 = vor.u32 %v4612_v58, %v3513_v61  ;;  %v5523_v29 = vpop.f32.mrf.mxu0  ;;  %v4692_v56 = vld [vmem:[#allocation5 + $0x48c] sm:$0xf]  ;;  %v3961_v61 = vld [vmem:[#allocation5 + $0x598] sm:$0xf0] }
 0x128   : > { %2275 = vmatpush.bf16.msra.mxu0 %v3308_v19  ;;  %v5521_v19 = vpop.f32.mrf.mxu3  ;;  %v4756_v62 = vld [vmem:[#allocation5 + $0x68c] sm:$0xf]  ;;  %v3801_v26 = vld [vmem:[#allocation5 + $0x458] sm:$0xf0] }
 0x129   : > { %2289 = vmatpush.bf16.msra.mxu1 %v3436_v20  ;;  %v4012_v20 = vor.u32 %v4736_v3, %v4009_v6  ;;  %v4688_v6 = vld [vmem:[#allocation5 + $0x46c] sm:$0xf] }
 0x12a   : > { %2303 = vmatpush.bf16.msra.mxu2 %v3564_v21  ;;  %v4140_v21 = vor.u32 %v4768_v7, %v4137_v8  ;;  %v3817_v7 = vld [vmem:[#allocation5 + $0x478] sm:$0xf0]  ;;  %v4720_v8 = vld [vmem:[#allocation5 + $0x56c] sm:$0xf] }
 0x12b   : > { %2317 = vmatpush.bf16.msra.mxu3 %v3692_v25  ;;  %v4268_v25 = vor.u32 %v4800_v13, %v4265_v14  ;;  %v5531_v58 = vpop.f32.mrf.mxu2  ;;  %v3945_v13 = vld [vmem:[#allocation5 + $0x578] sm:$0xf0]  ;;  %v4752_v14 = vld [vmem:[#allocation5 + $0x66c] sm:$0xf] }
 0x12c   : > { %2276 = vmatpush.bf16.msra.mxu0 %v3292_v32  ;;  %v4249_v32 = vld [vmem:[#allocation5 + $0x7d8] sm:$0xf0]  ;;  %v4716_v27 = vld [vmem:[#allocation5 + $0x54c] sm:$0xf] }
 0x12d   : > { %2290 = vmatpush.bf16.msra.mxu1 %v3420_v34  ;;  %v5525_v34 = vpop.f32.mrf.mxu1  ;;  %v4252_v42 = vor.u32 %v4796_v30, %v4249_v32  ;;  %v3929_v30 = vld [vmem:[#allocation5 + $0x558] sm:$0xf0]  ;;  %v4748_v32 = vld [vmem:[#allocation5 + $0x64c] sm:$0xf] }
 0x12e   : > { %2304 = vmatpush.bf16.msra.mxu2 %v3548_v35  ;;  %v3868_v35 = vor.u32 %v4700_v22, %v3865_v23  ;;  %v3820_v22 = vor.u32 %v4688_v6, %v3817_v7  ;;  %v3948_v23 = vor.u32 %v4720_v8, %v3945_v13  ;;  %v3897_v6 = vld [vmem:[#allocation5 + $0x518] sm:$0xf0] }
 0x12f   : > { %2318 = vmatpush.bf16.msra.mxu3 %v3676_v39  ;;  %v3849_v39 = vld [vmem:[#allocation5 + $0x4b8] sm:$0xf0]  ;;  %v5535_v1 = vpop.f32.mrf.mxu0 }
 0x130   : > { %2277 = vmatpush.bf16.msra.mxu0 %v3276_v51  ;;  %v4792_v51 = vld [vmem:[#allocation5 + $0x7ac] sm:$0xf]  ;;  %v3852_v53 = vor.u32 %v4696_v38, %v3849_v39  ;;  %v5533_v63 = vpop.f32.mrf.mxu3  ;;  %v4025_v13 = vld [vmem:[#allocation5 + $0x618] sm:$0xf0] }
 0x131   : > { %2291 = vmatpush.bf16.msra.mxu1 %v3404_v54  ;;  %v3980_v54 = vor.u32 %v4728_v41, %v3977_v43  ;;  %v3932_v43 = vor.u32 %v4716_v27, %v3929_v30 }
 0x132   : > { %2305 = vmatpush.bf16.msra.mxu2 %v3532_v55  ;;  %v4108_v55 = vor.u32 %v4760_v47, %v4105_v49 }
 0x133   : > { %2319 = vmatpush.bf16.msra.mxu3 %v3660_v60  ;;  %v4236_v60 = vor.u32 %v4792_v51, %v4233_v52  ;;  %v5542_v39 = vpop.f32.mrf.mxu2  ;;  %v4680_v51 = vld [vmem:[#allocation5 + $0x42c] sm:$0xf]  ;;  %v3785_v52 = vld [vmem:[#allocation5 + $0x438] sm:$0xf0] }
 0x134   : > { %2278 = vmatpush.bf16.msra.mxu0 %v3260_v5 }
 0x135   : > { %2292 = vmatpush.bf16.msra.mxu1 %v3388_v9  ;;  %v5537_v9 = vpop.f32.mrf.mxu1 }
 0x136   : > { %2306 = vmatpush.bf16.msra.mxu2 %v3516_v12 }
 0x137   : > { %2320 = vmatpush.bf16.msra.mxu3 %v3644_v16  ;;  %2279 = vmatmul.bf16.vlgmr.msra.gmra.mxu0 %v5454_v59  ;;  %v4089_v59 = vld [vmem:[#allocation5 + $0x698] sm:$0xf0]  ;;  %v2056_v49 = vpop.f32.mrf.mxu0 }
 0x138   : > { %2327 = vmatpush.bf16.msrb.mxu0 %v3884_v17  ;;  %2293 = vmatmul.bf16.vlgmr.msra.gmra.mxu1 %v5464_v11  ;;  %v3836_v11 = vor.u32 %v4692_v56, %v3833_v57  ;;  %v4092_v5 = vor.u32 %v4756_v62, %v4089_v59  ;;  %v4073_v16 = vld [vmem:[#allocation5 + $0x678] sm:$0xf0]  ;;  %v4784_v17 = vld [vmem:[#allocation5 + $0x76c] sm:$0xf]  ;;  %v3788_v59 = vor.u32 %v4680_v51, %v3785_v52 }
 0x139   : > { %2341 = vmatpush.bf16.msrb.mxu1 %v4012_v20  ;;  %2307 = vmatmul.bf16.vlgmr.msra.gmra.mxu2 %v5457_v2  ;;  %v4724_v2 = vld [vmem:[#allocation5 + $0x58c] sm:$0xf]  ;;  %v4201_v20 = vld [vmem:[#allocation5 + $0x778] sm:$0xf0]  ;;  %v4076_v24 = vor.u32 %v4752_v14, %v4073_v16 }
 0x13a   : > { %2355 = vmatpush.bf16.msrb.mxu2 %v4140_v21  ;;  %2321 = vmatmul.bf16.vlgmr.msra.gmra.mxu3 %v5467_v18  ;;  %v4788_v18 = vld [vmem:[#allocation5 + $0x78c] sm:$0xf]  ;;  %v3964_v3 = vor.u32 %v4724_v2, %v3961_v61  ;;  %v5539_v21 = vld [vmem:[#allocation7] sm:$0xf]  ;;  %v4204_v28 = vor.u32 %v4784_v17, %v4201_v20  ;;  %v4041_v57 = vld [vmem:[#allocation5 + $0x638] sm:$0xf0] }
 0x13b   : > { %2369 = vmatpush.bf16.msrb.mxu3 %v4268_v25  ;;  %v4220_v12 = vor.u32 %v4788_v18, %v4217_v0  ;;  %v4684_v25 = vld [vmem:[#allocation5 + $0x44c] sm:$0xf]  ;;  %v647_v38 = vperm.slane %v5539_v21, 0  ;;  %v4169_v61 = vld [vmem:[#allocation5 + $0x738] sm:$0xf0]  ;;  %v648_v62 = vperm.slane %v5539_v21, 1 }
 0x13c   : > { %2328 = vmatpush.bf16.msrb.mxu0 %v3868_v35  ;;  %v4057_v35 = vld [vmem:[#allocation5 + $0x658] sm:$0xf0]  ;;  %v3804_v41 = vor.u32 %v4684_v25, %v3801_v26  ;;  %v4744_v56 = vld [vmem:[#allocation5 + $0x62c] sm:$0xf]  ;;  %v4327_v17 = vld [vmem:[#allocation8 + $0x70] sm:$0xf]  ;;  %v2084_v26 = vpop.f32.mrf.mxu2 }
 0x13d   : > { %2342 = vmatpush.bf16.msrb.mxu1 %v3996_v36  ;;  %v4780_v36 = vld [vmem:[#allocation5 + $0x74c] sm:$0xf]  ;;  %v4060_v47 = vor.u32 %v4748_v32, %v4057_v35  ;;  %v2070_v2 = vpop.f32.mrf.mxu1  ;;  %v1945_v7 = vadd.f32 %v5507_v4, %v647_v38  ;;  %v4153_v16 = vld [vmem:[#allocation5 + $0x718] sm:$0xf0]  ;;  %v2057_v27 = vadd.f32 %v2056_v49, %v648_v62 }
 0x13e   : > { %2356 = vmatpush.bf16.msrb.mxu2 %v4124_v37  ;;  %v4185_v37 = vld [vmem:[#allocation5 + $0x758] sm:$0xf0]  ;;  %v4676_v18 = vld [vmem:[#allocation5 + $0x40c] sm:$0xf] }
 0x13f   : > { %2370 = vmatpush.bf16.msrb.mxu3 %v4252_v42  ;;  %v5544_v42 = vpop.f32.mrf.mxu3  ;;  %v4772_v14 = vld [vmem:[#allocation5 + $0x70c] sm:$0xf]  ;;  %v4818_v20 = vld [vmem:[#allocation8 + $0x74] sm:$0xf0]  ;;  %v1959_v32 = vadd.f32 %v5509_v10, %v1945_v7  ;;  %v2071_v52 = vadd.f32 %v2070_v2, %v2057_v27  ;;  %v4351_v27 = vld [vmem:[#allocation8 + $0xa0] sm:$0xf] }
 0x140   : > { %2329 = vmatpush.bf16.msrb.mxu0 %v3852_v53  ;;  %v4712_v53 = vld [vmem:[#allocation5 + $0x52c] sm:$0xf]  ;;  %v4834_v25 = vld [vmem:[#allocation8 + $0xf4] sm:$0xf0]  ;;  %v4156_v35 = vor.u32 %v4772_v14, %v4153_v16  ;;  %v4359_v16 = vld [vmem:[#allocation8 + $0xb0] sm:$0xf] }
 0x141   : > { %2343 = vmatpush.bf16.msrb.mxu1 %v3980_v54  ;;  %v4188_v54 = vor.u32 %v4780_v36, %v4185_v37  ;;  %v4328_v36 = vor.u32 %v4818_v20, %v4327_v17  ;;  %v4830_v2 = vld [vmem:[#allocation8 + $0xd4] sm:$0xf0] }
 0x142   : > { %2357 = vmatpush.bf16.msrb.mxu2 %v4108_v55  ;;  %v3913_v55 = vld [vmem:[#allocation5 + $0x538] sm:$0xf0] }
 0x143   : > { %2371 = vmatpush.bf16.msrb.mxu3 %v4236_v60  ;;  %v4776_v60 = vld [vmem:[#allocation5 + $0x72c] sm:$0xf]  ;;  %v3916_v0 = vor.u32 %v4712_v53, %v3913_v55  ;;  %v1973_v53 = vadd.f32 %v5511_v31, %v1959_v32  ;;  %v4810_v14 = vld [vmem:[#allocation8 + $0x34] sm:$0xf0] }
 0x144   : > { %2330 = vmatpush.bf16.msrb.mxu0 %v3836_v11  ;;  %v4044_v11 = vor.u32 %v4744_v56, %v4041_v57  ;;  %v4172_v8 = vor.u32 %v4776_v60, %v4169_v61  ;;  %v4311_v56 = vld [vmem:[#allocation8 + $0x50] sm:$0xf]  ;;  %v4814_v57 = vld [vmem:[#allocation8 + $0x54] sm:$0xf0]  ;;  %v2085_v61 = vadd.f32 %v2084_v26, %v2071_v52  ;;  %v4808_v26 = vld [vmem:[#allocation8 + $0x24] sm:$0xf0] }
 0x145   : > { %2344 = vmatpush.bf16.msrb.mxu1 %v3964_v3  ;;  %v3769_v3 = vld [vmem:[#allocation5 + $0x418] sm:$0xf0]  ;;  %v2072_v51 = vpop.f32.mrf.mxu1  ;;  %v1987_v31 = vadd.f32 %v5513_v33, %v1973_v53  ;;  %v4343_v52 = vld [vmem:[#allocation8 + $0x90] sm:$0xf] }
 0x146   : > { %2358 = vmatpush.bf16.msrb.mxu2 %v4092_v5  ;;  %v4708_v5 = vld [vmem:[#allocation5 + $0x50c] sm:$0xf]  ;;  %v4826_v17 = vld [vmem:[#allocation8 + $0xb4] sm:$0xf0] }
 0x147   : > { %2372 = vmatpush.bf16.msrb.mxu3 %v4220_v12  ;;  %v4740_v12 = vld [vmem:[#allocation5 + $0x60c] sm:$0xf]  ;;  %v2098_v30 = vpop.f32.mrf.mxu3  ;;  %v2001_v7 = vadd.f32 %v5523_v29, %v1987_v31  ;;  %v4360_v29 = vor.u32 %v4826_v17, %v4359_v16  ;;  %v4850_v32 = vld [vmem:[#allocation8 + $0x174] sm:$0xf0]  ;;  %v4335_v31 = vld [vmem:[#allocation8 + $0x80] sm:$0xf] }
 0x148   : > { %2331 = vmatpush.bf16.msrb.mxu0 %v3820_v22  ;;  %v1947_v22 = vadd.f32 %v5515_v46, %v647_v38  ;;  %v4028_v4 = vor.u32 %v4740_v12, %v4025_v13  ;;  %v4816_v46 = vld [vmem:[#allocation8 + $0x64] sm:$0xf0]  ;;  %v4383_v38 = vld [vmem:[#allocation8 + $0xe0] sm:$0xf]  ;;  %v4295_v13 = vld [vmem:[#allocation8 + $0x30] sm:$0xf] }
 0x149   : > { %2345 = vmatpush.bf16.msrb.mxu1 %v3948_v23  ;;  %v3772_v23 = vor.u32 %v4676_v18, %v3769_v3  ;;  %v4367_v3 = vld [vmem:[#allocation8 + $0xc0] sm:$0xf]  ;;  %v4844_v17 = vld [vmem:[#allocation8 + $0x144] sm:$0xf0] }
 0x14a   : > { %2359 = vmatpush.bf16.msrb.mxu2 %v4076_v24  ;;  %v4391_v24 = vld [vmem:[#allocation8 + $0xf0] sm:$0xf]  ;;  %v1961_v49 = vadd.f32 %v5517_v50, %v1947_v22  ;;  %v4431_v16 = vld [vmem:[#allocation8 + $0x140] sm:$0xf] }
 0x14b   : > { %2373 = vmatpush.bf16.msrb.mxu3 %v4204_v28  ;;  %v3900_v28 = vor.u32 %v4708_v5, %v3897_v6  ;;  %v4392_v37 = vor.u32 %v4834_v25, %v4391_v24  ;;  %v4375_v50 = vld [vmem:[#allocation8 + $0xd0] sm:$0xf]  ;;  %v2099_v6 = vadd.f32 %v2098_v30, %v2085_v61  ;;  %v4287_v25 = vld [vmem:[#allocation8 + $0x20] sm:$0xf] }
 0x14c   : > { %2332 = vmatpush.bf16.msrb.mxu0 %v3804_v41  ;;  %v2058_v41 = vpop.f32.mrf.mxu0  ;;  %v1975_v60 = vadd.f32 %v5519_v15, %v1961_v49  ;;  %v4376_v18 = vor.u32 %v4830_v2, %v4375_v50  ;;  %v4455_v30 = vld [vmem:[#allocation8 + $0x170] sm:$0xf]  ;;  %v4806_v49 = vld [vmem:[#allocation8 + $0x14] sm:$0xf0]  ;;  %v4271_v50 = vld [vmem:[#allocation8] sm:$0xf] }
 0x14d   : > { %2346 = vmatpush.bf16.msrb.mxu1 %v3932_v43  ;;  %v4319_v43 = vld [vmem:[#allocation8 + $0x60] sm:$0xf]  ;;  %v4804_v2 = vld [vmem:[#allocation8 + $0x4] sm:$0xf0] }
 0x14e   : > { %2360 = vmatpush.bf16.msrb.mxu2 %v4060_v47  ;;  %v4832_v47 = vld [vmem:[#allocation8 + $0xe4] sm:$0xf0]  ;;  %v4320_v10 = vor.u32 %v4816_v46, %v4319_v43  ;;  %v1989_v5 = vadd.f32 %v5521_v19, %v1975_v60  ;;  %v4296_v19 = vor.u32 %v4810_v14, %v4295_v13  ;;  %v4288_v43 = vor.u32 %v4808_v26, %v4287_v25  ;;  %v4321_v14 = vld [vmem:[#allocation8 + $0x68] sm:$0xf0] }
 0x14f   : > { %2374 = vmatpush.bf16.msrb.mxu3 %v4188_v54  ;;  %v2059_v54 = vadd.f32 %v2058_v41, %v648_v62  ;;  %v4384_v55 = vor.u32 %v4832_v47, %v4383_v38  ;;  %v4456_v41 = vor.u32 %v4850_v32, %v4455_v30  ;;  %v4813_v30 = vld [vmem:[#allocation8 + $0x54] sm:$0xf]  ;;  %v4313_v32 = vld [vmem:[#allocation8 + $0x58] sm:$0xf0] }
 0x150   : > { %2333 = vmatpush.bf16.msrb.mxu0 %v3788_v59  ;;  %v4312_v59 = vor.u32 %v4814_v57, %v4311_v56  ;;  %v2003_v20 = vadd.f32 %v5535_v1, %v1989_v5  ;;  %v4393_v5 = vld [vmem:[#allocation8 + $0xf8] sm:$0xf0] }
 0x151   : > { %2347 = vmatpush.bf16.msrb.mxu1 %v3916_v0  ;;  %v2073_v62 = vadd.f32 %v2072_v51, %v2059_v54  ;;  %v2100_v0 = vpop.f32.mrf.mxu3  ;;  %v4279_v51 = vld [vmem:[#allocation8 + $0x10] sm:$0xf]  ;;  %v4848_v54 = vld [vmem:[#allocation8 + $0x164] sm:$0xf0] }
 0x152   : > { %2361 = vmatpush.bf16.msrb.mxu2 %v4044_v11  ;;  %v4303_v11 = vld [vmem:[#allocation8 + $0x40] sm:$0xf] }
 0x153   : > { %2375 = vmatpush.bf16.msrb.mxu3 %v4172_v8 }
 0x154   : > { %2334 = vmatpush.bf16.msrb.mxu0 %v3772_v23  ;;  %v2112_v15 = vpop.f32.mrf.mxu0  ;;  %v2015_v23 = vadd.f32 %v5525_v34, %v2001_v7 }
 0x155   : > { %2348 = vmatpush.bf16.msrb.mxu1 %v3900_v28  ;;  %v2126_v33 = vpop.f32.mrf.mxu1  ;;  %v2113_v22 = vadd.f32 %v2112_v15, %v2099_v6 }
 0x156   : > { %2362 = vmatpush.bf16.msrb.mxu2 %v4028_v4  ;;  %v4824_v4 = vld [vmem:[#allocation8 + $0xa4] sm:$0xf0]  ;;  %v2029_v34 = vadd.f32 %v5531_v58, %v2015_v23  ;;  %v4280_v58 = vor.u32 %v4806_v49, %v4279_v51  ;;  %v4831_v23 = vld [vmem:[#allocation8 + $0xe4] sm:$0xf]  ;;  %v4369_v49 = vld [vmem:[#allocation8 + $0xc8] sm:$0xf0] }
 0x157   : > { %2376 = vmatpush.bf16.msrb.mxu3 %v4156_v35  ;;  %2335 = vmatmul.bf16.vlgmr.msrb.gmra.mxu0 %v5479_v40  ;;  %v2086_v40 = vpop.f32.mrf.mxu2  ;;  %v2017_v35 = vadd.f32 %v5537_v9, %v2003_v20  ;;  %v4352_v47 = vor.u32 %v4824_v4, %v4351_v27  ;;  %v4447_v9 = vld [vmem:[#allocation8 + $0x160] sm:$0xf]  ;;  %v4423_v27 = vld [vmem:[#allocation8 + $0x130] sm:$0xf]  ;;  %v4827_v51 = vld [vmem:[#allocation8 + $0xc4] sm:$0xf] }
 0x158   : > { %2785 = vmatpush.bf16.msra.mxu0 %v4328_v36  ;;  %2349 = vmatmul.bf16.vlgmr.msrb.gmra.mxu1 %v5483_v45  ;;  %v4812_v45 = vld [vmem:[#allocation8 + $0x44] sm:$0xf0]  ;;  %v2087_v8 = vadd.f32 %v2086_v40, %v2073_v62  ;;  %v2127_v36 = vadd.f32 %v2126_v33, %v2113_v22  ;;  %v4448_v56 = vor.u32 %v4848_v54, %v4447_v9  ;;  %v4817_v40 = vld [vmem:[#allocation8 + $0x74] sm:$0xf]  ;;  %v4297_v9 = vld [vmem:[#allocation8 + $0x38] sm:$0xf0] }
 0x159   : > { %2799 = vmatpush.bf16.msra.mxu1 %v4392_v37  ;;  %2363 = vmatmul.bf16.vlgmr.msrb.gmra.mxu2 %v5481_v44  ;;  %v4828_v44 = vld [vmem:[#allocation8 + $0xc4] sm:$0xf0]  ;;  %v2031_v46 = vadd.f32 %v5542_v39, %v2017_v35  ;;  %v2043_v57 = vadd.f32 %v5533_v63, %v2029_v34  ;;  %v4829_v35 = vld [vmem:[#allocation8 + $0xd4] sm:$0xf]  ;;  %v4316_v34 = vor.u32 %v4813_v30, %v4313_v32  ;;  %v4407_v54 = vld [vmem:[#allocation8 + $0x110] sm:$0xf] }
 0x15a   : > { %2377 = vmatmul.bf16.vlgmr.msrb.gmra.mxu3 %v5485_v48  ;;  %v4304_v48 = vor.u32 %v4812_v45, %v4303_v11  ;;  %v4368_v12 = vor.u32 %v4828_v44, %v4367_v3  ;;  %v2101_v24 = vadd.f32 %v2100_v0, %v2087_v8  ;;  %2813 = vmatpush.bf16.msra.mxu2 %v4456_v41  ;;  %v4439_v0 = vld [vmem:[#allocation8 + $0x150] sm:$0xf]  ;;  %v4846_v11 = vld [vmem:[#allocation8 + $0x154] sm:$0xf0]  ;;  %v4833_v44 = vld [vmem:[#allocation8 + $0xf4] sm:$0xf] }
 0x15b   : > { %v2045_v39 = vadd.f32 %v5544_v42, %v2031_v46  ;;  %v4440_v6 = vor.u32 %v4846_v11, %v4439_v0  ;;  %v2383_v15 = vmax.f32 %v2043_v57, 0.0  ;;  %v4272_v42 = vor.u32 %v4804_v2, %v4271_v50  ;;  %v4840_v41 = vld [vmem:[#allocation8 + $0x124] sm:$0xf0]  ;;  %v4811_v46 = vld [vmem:[#allocation8 + $0x44] sm:$0xf] }
 0x15c   : > { %2786 = vmatpush.bf16.msra.mxu0 %v4320_v10  ;;  %v2114_v37 = vpop.f32.mrf.mxu0  ;;  %v4822_v10 = vld [vmem:[#allocation8 + $0x94] sm:$0xf0]  ;;  %v4396_v13 = vor.u32 %v4833_v44, %v4393_v5  ;;  %v4361_v57 = vld [vmem:[#allocation8 + $0xb8] sm:$0xf0]  ;;  %v4807_v2 = vld [vmem:[#allocation8 + $0x24] sm:$0xf] }
 0x15d   : > { %2800 = vmatpush.bf16.msra.mxu1 %v4384_v55  ;;  %v2154_v1 = vpop.f32.mrf.mxu3  ;;  %v2115_v38 = vadd.f32 %v2114_v37, %v2101_v24  ;;  %v2128_v53 = vpop.f32.mrf.mxu1  ;;  %v4344_v61 = vor.u32 %v4822_v10, %v4343_v52  ;;  %v2387_v7 = vmax.f32 %v2045_v39, 0.0  ;;  %v4432_v24 = vor.u32 %v4844_v17, %v4431_v16  ;;  %v4377_v37 = vld [vmem:[#allocation8 + $0xd8] sm:$0xf0]  ;;  %v4289_v39 = vld [vmem:[#allocation8 + $0x28] sm:$0xf0] }
 0x15e   : > { %2814 = vmatpush.bf16.msra.mxu2 %v4448_v56  ;;  %v4372_v10 = vor.u32 %v4827_v51, %v4369_v49  ;;  %v4825_v56 = vld [vmem:[#allocation8 + $0xb4] sm:$0xf]  ;;  %v4457_v0 = vld [vmem:[#allocation8 + $0x178] sm:$0xf0]  ;;  %v4273_v16 = vld [vmem:[#allocation8 + $0x8] sm:$0xf0] }
 0x15f   : > { %v2140_v28 = vpop.f32.mrf.mxu2  ;;  %v2129_v60 = vadd.f32 %v2128_v53, %v2115_v38  ;;  %v4305_v38 = vld [vmem:[#allocation8 + $0x48] sm:$0xf0]  ;;  %v4809_v53 = vld [vmem:[#allocation8 + $0x34] sm:$0xf]  ;;  %v4281_v44 = vld [vmem:[#allocation8 + $0x18] sm:$0xf0] }
 0x160   : > { %2787 = vmatpush.bf16.msra.mxu0 %v4312_v59  ;;  %v2141_v55 = vadd.f32 %v2140_v28, %v2127_v36  ;;  %v4820_v59 = vld [vmem:[#allocation8 + $0x84] sm:$0xf0]  ;;  %v4842_v28 = vld [vmem:[#allocation8 + $0x134] sm:$0xf0]  ;;  %v4308_v52 = vor.u32 %v4811_v46, %v4305_v38  ;;  %v4300_v50 = vor.u32 %v4809_v53, %v4297_v9  ;;  %v4821_v5 = vld [vmem:[#allocation8 + $0x94] sm:$0xf] }
 0x161   : > { %2801 = vmatpush.bf16.msra.mxu1 %v4376_v18  ;;  %v4329_v18 = vld [vmem:[#allocation8 + $0x78] sm:$0xf0]  ;;  %v4336_v33 = vor.u32 %v4820_v59, %v4335_v31  ;;  %v4424_v36 = vor.u32 %v4842_v28, %v4423_v27  ;;  %v4399_v31 = vld [vmem:[#allocation8 + $0x100] sm:$0xf]  ;;  %v4836_v59 = vld [vmem:[#allocation8 + $0x104] sm:$0xf0] }
 0x162   : > { %v2155_v45 = vadd.f32 %v2154_v1, %v2141_v55  ;;  %v4332_v8 = vor.u32 %v4817_v40, %v4329_v18  ;;  %2815 = vmatpush.bf16.msra.mxu2 %v4440_v6  ;;  %v4415_v1 = vld [vmem:[#allocation8 + $0x120] sm:$0xf]  ;;  %v4838_v55 = vld [vmem:[#allocation8 + $0x114] sm:$0xf0]  ;;  %v4353_v40 = vld [vmem:[#allocation8 + $0xa8] sm:$0xf0] }
 0x163   : > { %v4849_v18 = vld [vmem:[#allocation8 + $0x174] sm:$0xf]  ;;  %v4819_v17 = vld [vmem:[#allocation8 + $0x84] sm:$0xf]  ;;  %v4433_v32 = vld [vmem:[#allocation8 + $0x148] sm:$0xf0] }
 0x164   : > { %2788 = vmatpush.bf16.msra.mxu0 %v4304_v48  ;;  %v2384_v20 = vmax.f32 %v2155_v45, 0.0  ;;  %v4460_v11 = vor.u32 %v4849_v18, %v4457_v0  ;;  %v4292_v45 = vor.u32 %v4807_v2, %v4289_v39  ;;  %v4843_v30 = vld [vmem:[#allocation8 + $0x144] sm:$0xf]  ;;  %v4417_v38 = vld [vmem:[#allocation8 + $0x128] sm:$0xf0] }
 0x165   : > { %2802 = vmatpush.bf16.msra.mxu1 %v4368_v12  ;;  %v2156_v63 = vpop.f32.mrf.mxu3  ;;  %v4815_v12 = vld [vmem:[#allocation8 + $0x64] sm:$0xf]  ;;  %v4837_v53 = vld [vmem:[#allocation8 + $0x114] sm:$0xf]  ;;  %v4401_v2 = vld [vmem:[#allocation8 + $0x108] sm:$0xf0] }
 0x166   : > { %v4324_v26 = vor.u32 %v4815_v12, %v4321_v14  ;;  %2816 = vmatpush.bf16.msra.mxu2 %v4432_v24  ;;  %v4803_v14 = vld [vmem:[#allocation8 + $0x4] sm:$0xf]  ;;  %v4866_v39 = vld [vmem:[#allocation8 + $0x1f4] sm:$0xf0] }
 0x167   : > { %v2142_v62 = vpop.f32.mrf.mxu2  ;;  %v4276_v24 = vor.u32 %v4803_v14, %v4273_v16  ;;  %v4839_v46 = vld [vmem:[#allocation8 + $0x124] sm:$0xf] }
 0x168   : > { %2789 = vmatpush.bf16.msra.mxu0 %v4296_v19  ;;  %v2143_v3 = vadd.f32 %v2142_v62, %v2129_v60  ;;  %v4385_v19 = vld [vmem:[#allocation8 + $0xe8] sm:$0xf0]  ;;  %v4364_v60 = vor.u32 %v4825_v56, %v4361_v57  ;;  %v4400_v62 = vor.u32 %v4836_v59, %v4399_v31  ;;  %v4420_v49 = vor.u32 %v4839_v46, %v4417_v38  ;;  %v4863_v46 = vld [vmem:[#allocation8 + $0x1e4] sm:$0xf] }
 0x169   : > { %2803 = vmatpush.bf16.msra.mxu1 %v4360_v29  ;;  %v5567_v29 = vpack.c.bf16 %v2387_v7, %v2383_v15  ;;  %v4388_v4 = vor.u32 %v4831_v23, %v4385_v19  ;;  %v4345_v15 = vld [vmem:[#allocation8 + $0x98] sm:$0xf0]  ;;  %v4449_v7 = vld [vmem:[#allocation8 + $0x168] sm:$0xf0] }
 0x16a   : > { %v2157_v48 = vadd.f32 %v2156_v63, %v2143_v3  ;;  %2817 = vmatpush.bf16.msra.mxu2 %v4424_v36  ;;  %v4805_v63 = vld [vmem:[#allocation8 + $0x14] sm:$0xf]  ;;  %v4441_v23 = vld [vmem:[#allocation8 + $0x158] sm:$0xf0]  ;;  %v4513_v38 = vld [vmem:[#allocation8 + $0x1e8] sm:$0xf0] }
 0x16b   : > { %v4284_v12 = vor.u32 %v4805_v63, %v4281_v44  ;;  %v4862_v44 = vld [vmem:[#allocation8 + $0x1d4] sm:$0xf0] }
 0x16c   : > { %2790 = vmatpush.bf16.msra.mxu0 %v4288_v43  ;;  %v2388_v22 = vmax.f32 %v2157_v48, 0.0  ;;  %v4380_v43 = vor.u32 %v4829_v35, %v4377_v37  ;;  %v4436_v35 = vor.u32 %v4843_v30, %v4433_v32  ;;  %v4471_v30 = vld [vmem:[#allocation8 + $0x190] sm:$0xf]  ;;  %v4854_v32 = vld [vmem:[#allocation8 + $0x194] sm:$0xf0] }
 0x16d   : > { %2804 = vmatpush.bf16.msra.mxu1 %v4352_v47  ;;  %v4416_v47 = vor.u32 %v4840_v41, %v4415_v1  ;;  %v4841_v41 = vld [vmem:[#allocation8 + $0x134] sm:$0xf] }
 0x16e   : > { %v5569_v25 = vpack.c.bf16 %v2388_v22, %v2384_v20  ;;  %v4337_v20 = vld [vmem:[#allocation8 + $0x88] sm:$0xf0]  ;;  %v4845_v22 = vld [vmem:[#allocation8 + $0x154] sm:$0xf] }
 0x16f   : > { %2818 = vmatpush.bf16.msra.mxu2 %v4416_v47  ;;  %v4444_v19 = vor.u32 %v4845_v22, %v4441_v23 }
 0x170   : > { %2791 = vmatpush.bf16.msra.mxu0 %v4280_v58  ;;  %v4408_v58 = vor.u32 %v4838_v55, %v4407_v54 }
 0x171   : > { %2805 = vmatpush.bf16.msra.mxu1 %v4344_v61  ;;  %v4823_v61 = vld [vmem:[#allocation8 + $0xa4] sm:$0xf] }
 0x172   : > { %v4356_v3 = vor.u32 %v4823_v61, %v4353_v40 }
 0x173   : > { %2819 = vmatpush.bf16.msra.mxu2 %v4408_v58  ;;  %v4519_v58 = vld [vmem:[#allocation8 + $0x1f0] sm:$0xf] }
 0x174   : > { %2792 = vmatpush.bf16.msra.mxu0 %v4272_v42  ;;  %v2168_v6 = vpop.f32.mrf.mxu0  ;;  %v4847_v42 = vld [vmem:[#allocation8 + $0x164] sm:$0xf] }
 0x175   : > { %2806 = vmatpush.bf16.msra.mxu1 %v4336_v33  ;;  %v2182_v48 = vpop.f32.mrf.mxu1  ;;  %v4452_v33 = vor.u32 %v4847_v42, %v4449_v7  ;;  %v4495_v7 = vld [vmem:[#allocation8 + $0x1c0] sm:$0xf] }
 0x177   : > { %2793 = vmatmul.bf16.vlgmr.msra.gmra.mxu0 %v5567_v29  ;;  %2820 = vmatpush.bf16.msra.mxu2 %v4400_v62 }
 0x178   : > { %2841 = vmatpush.bf16.msrb.mxu0 %v4332_v8  ;;  %2807 = vmatmul.bf16.vlgmr.msra.gmra.mxu1 %v5569_v25  ;;  %v649_v8 = vperm.slane %v5539_v21, 2 }
 0x179   : > { %2855 = vmatpush.bf16.msrb.mxu1 %v4396_v13  ;;  %v4348_v13 = vor.u32 %v4821_v5, %v4345_v15 }
 0x17a   : > { %v2169_v28 = vadd.f32 %v2168_v6, %v649_v8 }
 0x17b   : > { %2869 = vmatpush.bf16.msrb.mxu2 %v4460_v11  ;;  %v4511_v11 = vld [vmem:[#allocation8 + $0x1e0] sm:$0xf] }
 0x17c   : > { %2842 = vmatpush.bf16.msrb.mxu0 %v4324_v26  ;;  %v4340_v26 = vor.u32 %v4819_v17, %v4337_v20  ;;  %v2196_v27 = vpop.f32.mrf.mxu2  ;;  %v2170_v36 = vpop.f32.mrf.mxu0  ;;  %v2183_v1 = vadd.f32 %v2182_v48, %v2169_v28  ;;  %v4860_v48 = vld [vmem:[#allocation8 + $0x1c4] sm:$0xf0]  ;;  %v4487_v17 = vld [vmem:[#allocation8 + $0x1b0] sm:$0xf]  ;;  %v4858_v20 = vld [vmem:[#allocation8 + $0x1b4] sm:$0xf0] }
 0x17d   : > { %2856 = vmatpush.bf16.msrb.mxu1 %v4388_v4  ;;  %v2210_v4 = vpop.f32.mrf.mxu3  ;;  %v2184_v37 = vpop.f32.mrf.mxu1  ;;  %v2171_v47 = vadd.f32 %v2170_v36, %v649_v8  ;;  %v4488_v23 = vor.u32 %v4858_v20, %v4487_v17  ;;  %v4463_v36 = vld [vmem:[#allocation8 + $0x180] sm:$0xf] }
 0x17e   : > { %v2197_v51 = vadd.f32 %v2196_v27, %v2183_v1  ;;  %v4856_v27 = vld [vmem:[#allocation8 + $0x1a4] sm:$0xf0] }
 0x17f   : > { %2870 = vmatpush.bf16.msrb.mxu2 %v4452_v33  ;;  %v2185_v9 = vadd.f32 %v2184_v37, %v2171_v47  ;;  %v4852_v37 = vld [vmem:[#allocation8 + $0x184] sm:$0xf0]  ;;  %v4516_v47 = vor.u32 %v4863_v46, %v4513_v38 }
 0x180   : > { %2843 = vmatpush.bf16.msrb.mxu0 %v4316_v34  ;;  %v4425_v34 = vld [vmem:[#allocation8 + $0x138] sm:$0xf0]  ;;  %v2211_v55 = vadd.f32 %v2210_v4, %v2197_v51  ;;  %v4464_v1 = vor.u32 %v4852_v37, %v4463_v36 }
 0x181   : > { %2857 = vmatpush.bf16.msrb.mxu1 %v4380_v43  ;;  %v4428_v43 = vor.u32 %v4841_v41, %v4425_v34  ;;  %v4865_v41 = vld [vmem:[#allocation8 + $0x1f4] sm:$0xf]  ;;  %v4521_v34 = vld [vmem:[#allocation8 + $0x1f8] sm:$0xf0] }
 0x183   : > { %2871 = vmatpush.bf16.msrb.mxu2 %v4444_v19 }
 0x184   : > { %2844 = vmatpush.bf16.msrb.mxu0 %v4308_v52  ;;  %v2198_v52 = vpop.f32.mrf.mxu2 }
 0x185   : > { %2858 = vmatpush.bf16.msrb.mxu1 %v4372_v10  ;;  %v4409_v10 = vld [vmem:[#allocation8 + $0x118] sm:$0xf0]  ;;  %v2212_v54 = vpop.f32.mrf.mxu3 }
 0x186   : > { %v4412_v57 = vor.u32 %v4837_v53, %v4409_v10 }
 0x187   : > { %2872 = vmatpush.bf16.msrb.mxu2 %v4436_v35  ;;  %v4472_v35 = vor.u32 %v4854_v32, %v4471_v30 }
 0x188   : > { %2845 = vmatpush.bf16.msrb.mxu0 %v4300_v50  ;;  %v4835_v50 = vld [vmem:[#allocation8 + $0x104] sm:$0xf] }
 0x189   : > { %2859 = vmatpush.bf16.msrb.mxu1 %v4364_v60  ;;  %v2199_v60 = vadd.f32 %v2198_v52, %v2185_v9  ;;  %v4404_v31 = vor.u32 %v4835_v50, %v4401_v2  ;;  %v4505_v52 = vld [vmem:[#allocation8 + $0x1d8] sm:$0xf0]  ;;  %v4859_v9 = vld [vmem:[#allocation8 + $0x1c4] sm:$0xf] }
 0x18a   : > { %v4489_v50 = vld [vmem:[#allocation8 + $0x1b8] sm:$0xf0] }
 0x18b   : > { %2873 = vmatpush.bf16.msrb.mxu2 %v4428_v43  ;;  %v2213_v59 = vadd.f32 %v2212_v54, %v2199_v60  ;;  %v4524_v43 = vor.u32 %v4865_v41, %v4521_v34  ;;  %v4497_v54 = vld [vmem:[#allocation8 + $0x1c8] sm:$0xf0]  ;;  %v2459_v41 = vld [vmem:[%s5638_s4] sm:$0x3] }
 0x18c   : > { %2846 = vmatpush.bf16.msrb.mxu0 %v4292_v45  ;;  %v4864_v45 = vld [vmem:[#allocation8 + $0x1e4] sm:$0xf0]  ;;  %v2461_v46 = vperm.slane %v2459_v41, 0 }
 0x18d   : > { %2860 = vmatpush.bf16.msrb.mxu1 %v4356_v3  ;;  %v4503_v3 = vld [vmem:[#allocation8 + $0x1d0] sm:$0xf]  ;;  %v4512_v63 = vor.u32 %v4864_v45, %v4511_v11 }
 0x18e   : > { %v4504_v15 = vor.u32 %v4862_v44, %v4503_v3 }
 0x18f   : > { %2874 = vmatpush.bf16.msrb.mxu2 %v4420_v49  ;;  %v4861_v49 = vld [vmem:[#allocation8 + $0x1d4] sm:$0xf] }
 0x190   : > { %2847 = vmatpush.bf16.msrb.mxu0 %v4284_v12  ;;  %v4496_v12 = vor.u32 %v4860_v48, %v4495_v7  ;;  %v4508_v53 = vor.u32 %v4861_v49, %v4505_v52  ;;  %v2462_v49 = vperm.slane %v2459_v41, 1 }
 0x191   : > { %2861 = vmatpush.bf16.msrb.mxu1 %v4348_v13 }
 0x193   : > { %2875 = vmatpush.bf16.msrb.mxu2 %v4412_v57 }
 0x194   : > { %2848 = vmatpush.bf16.msrb.mxu0 %v4276_v24  ;;  %v2224_v56 = vpop.f32.mrf.mxu0 }
 0x195   : > { %2862 = vmatpush.bf16.msrb.mxu1 %v4340_v26  ;;  %v2225_v61 = vadd.f32 %v2224_v56, %v2211_v55  ;;  %v4479_v26 = vld [vmem:[#allocation8 + $0x1a0] sm:$0xf]  ;;  %v650_v55 = vperm.slane %v5539_v21, 3  ;;  %v4500_v56 = vor.u32 %v4859_v9, %v4497_v54  ;;  %v4473_v21 = vld [vmem:[#allocation8 + $0x198] sm:$0xf0] }
 0x196   : > { %v4480_v4 = vor.u32 %v4856_v27, %v4479_v26 }
 0x197   : > { %2849 = vmatmul.bf16.vlgmr.msrb.gmra.mxu0 %v5567_v29  ;;  %v2238_v29 = vpop.f32.mrf.mxu1  ;;  %2876 = vmatpush.bf16.msrb.mxu2 %v4404_v31 }
 0x198   : > { %2863 = vmatmul.bf16.vlgmr.msrb.gmra.mxu1 %v5569_v25  ;;  %v4520_v25 = vor.u32 %v4866_v39, %v4519_v58  ;;  %v2239_v62 = vadd.f32 %v2238_v29, %v2225_v61  ;;  %v4857_v29 = vld [vmem:[#allocation8 + $0x1b4] sm:$0xf]  ;;  %v4481_v61 = vld [vmem:[#allocation8 + $0x1a8] sm:$0xf0] }
 0x199   : > { %v4492_v60 = vor.u32 %v4857_v29, %v4489_v50  ;;  %v2901_v50 = vld [vmem:[%s5639_s5] sm:$0x3] }
 0x19a   : > { %2827 = vmatpush.bf16.msra.mxu3 %v4520_v25  ;;  %v4855_v25 = vld [vmem:[#allocation8 + $0x1a4] sm:$0xf] }
 0x19b   : > { %v4484_v31 = vor.u32 %v4855_v25, %v4481_v61 }
 0x19c   : > { %v2252_v40 = vpop.f32.mrf.mxu2  ;;  %v2226_v18 = vpop.f32.mrf.mxu0 }
 0x19d   : > { %v2266_v0 = vpop.f32.mrf.mxu3  ;;  %v2227_v5 = vadd.f32 %v2226_v18, %v2213_v59  ;;  %v2253_v42 = vadd.f32 %v2252_v40, %v2239_v62 }
 0x19e   : > { %2828 = vmatpush.bf16.msra.mxu3 %v4512_v63 }
 0x19f   : > { %v2240_v6 = vpop.f32.mrf.mxu1  ;;  %v2267_v13 = vadd.f32 %v2266_v0, %v2253_v42  ;;  %v4853_v0 = vld [vmem:[#allocation8 + $0x194] sm:$0xf] }
 0x1a0   : > { %v2241_v33 = vadd.f32 %v2240_v6, %v2227_v5  ;;  %v4476_v44 = vor.u32 %v4853_v0, %v4473_v21  ;;  %v4851_v5 = vld [vmem:[#allocation8 + $0x184] sm:$0xf]  ;;  %v4465_v6 = vld [vmem:[#allocation8 + $0x188] sm:$0xf0] }
 0x1a1   : > { %v2385_v19 = vmax.f32 %v2267_v13, 0.0 }
 0x1a2   : > { %2829 = vmatpush.bf16.msra.mxu3 %v4504_v15  ;;  %v4468_v15 = vor.u32 %v4851_v5, %v4465_v6 }
 0x1a4   : > { %v2254_v8 = vpop.f32.mrf.mxu2 }
 0x1a5   : > { %v2255_v14 = vadd.f32 %v2254_v8, %v2241_v33  ;;  %v2268_v16 = vpop.f32.mrf.mxu3 }
 0x1a6   : > { %2830 = vmatpush.bf16.msra.mxu3 %v4496_v12 }
 0x1a7   : > { %v2269_v22 = vadd.f32 %v2268_v16, %v2255_v14 }
 0x1a9   : > { %v2389_v24 = vmax.f32 %v2269_v22, 0.0 }
 0x1aa   : > { %2831 = vmatpush.bf16.msra.mxu3 %v4488_v23 }
 0x1ab   : > { %v2393_v28 = vpack.c.bf16 %v2389_v24, %v2385_v19 }
 0x1ad   : > { %2821 = vmatmul.bf16.vlgmr.msra.gmra.mxu2 %v2393_v28 }
 0x1ae   : > { %2832 = vmatpush.bf16.msra.mxu3 %v4480_v4 }
 0x1b2   : > { %2833 = vmatpush.bf16.msra.mxu3 %v4472_v35 }
 0x1b4   : > { %v2280_v51 = vpop.f32.mrf.mxu0 }
 0x1b5   : > { %v2294_v10 = vpop.f32.mrf.mxu1  ;;  %v2281_v2 = vadd.f32 %v2280_v51, %v650_v55 }
 0x1b6   : > { %2834 = vmatpush.bf16.msra.mxu3 %v4464_v1 }
 0x1b7   : > { %v2295_v40 = vadd.f32 %v2294_v10, %v2281_v2 }
 0x1ba   : > { %2883 = vmatpush.bf16.msrb.mxu3 %v4524_v43 }
 0x1bc   : > { %v2308_v57 = vpop.f32.mrf.mxu2  ;;  %v2282_v39 = vpop.f32.mrf.mxu0 }
 0x1bd   : > { %2877 = vmatmul.bf16.vlgmr.msrb.gmra.mxu2 %v2393_v28  ;;  %v2322_v58 = vpop.f32.mrf.mxu3  ;;  %v2296_v59 = vpop.f32.mrf.mxu1  ;;  %v2283_v62 = vadd.f32 %v2282_v39, %v650_v55  ;;  %v2309_v11 = vadd.f32 %v2308_v57, %v2295_v40  ;;  %v2904_v40 = vperm.slane %v2901_v50, 1 }
 0x1be   : > { %2884 = vmatpush.bf16.msrb.mxu3 %v4516_v47 }
 0x1bf   : > { %v2297_v45 = vadd.f32 %v2296_v59, %v2283_v62  ;;  %v2323_v7 = vadd.f32 %v2322_v58, %v2309_v11 }
 0x1c2   : > { %2885 = vmatpush.bf16.msrb.mxu3 %v4508_v53 }
 0x1c4   : > { %v2310_v18 = vpop.f32.mrf.mxu2 }
 0x1c5   : > { %v2324_v3 = vpop.f32.mrf.mxu3  ;;  %v2311_v48 = vadd.f32 %v2310_v18, %v2297_v45 }
 0x1c6   : > { %2886 = vmatpush.bf16.msrb.mxu3 %v4500_v56 }
 0x1c7   : > { %v2325_v12 = vadd.f32 %v2324_v3, %v2311_v48 }
 0x1ca   : > { %2887 = vmatpush.bf16.msrb.mxu3 %v4492_v60 }
 0x1ce   : > { %2888 = vmatpush.bf16.msrb.mxu3 %v4484_v31  ;;  %v2903_v31 = vperm.slane %v2901_v50, 0 }
 0x1d2   : > { %2889 = vmatpush.bf16.msrb.mxu3 %v4476_v44 }
 0x1d4   : > { %v2336_v63 = vpop.f32.mrf.mxu0 }
 0x1d5   : > { %v2350_v42 = vpop.f32.mrf.mxu1  ;;  %v2337_v33 = vadd.f32 %v2336_v63, %v2323_v7 }
 0x1d6   : > { %2890 = vmatpush.bf16.msrb.mxu3 %v4468_v15 }
 0x1d7   : > { %v2351_v16 = vadd.f32 %v2350_v42, %v2337_v33 }
 0x1dc   : > { %v2364_v8 = vpop.f32.mrf.mxu2  ;;  %v2338_v14 = vpop.f32.mrf.mxu0 }
 0x1dd   : > { %v2378_v13 = vpop.f32.mrf.mxu3  ;;  %v2339_v17 = vadd.f32 %v2338_v14, %v2325_v12  ;;  %v2365_v20 = vadd.f32 %v2364_v8, %v2351_v16  ;;  %v2352_v22 = vpop.f32.mrf.mxu1  ;;  %v5004_v12 = vld [vmem:[#allocation2] ss:$0 sm:$0xff] }
 0x1df   : > { %v2353_v23 = vadd.f32 %v2352_v22, %v2339_v17  ;;  %v2379_v24 = vadd.f32 %v2378_v13, %v2365_v20 }
 0x1e1   : > { %v2386_v4 = vmax.f32 %v2379_v24, 0.0 }
 0x1e4   : > { %v2366_v19 = vpop.f32.mrf.mxu2 }
 0x1e5   : > { %v2367_v26 = vadd.f32 %v2366_v19, %v2353_v23  ;;  %v2380_v27 = vpop.f32.mrf.mxu3 }
 0x1e7   : > { %v2381_v28 = vadd.f32 %v2380_v27, %v2367_v26 }
 0x1e9   : > { %v2390_v30 = vmax.f32 %v2381_v28, 0.0 }
 0x1eb   : > { %v2394_v32 = vpack.c.bf16 %v2390_v30, %v2386_v4 }
 0x1ed   : > { %2835 = vmatmul.bf16.vlgmr.msra.gmra.mxu3 %v2394_v32 }
 0x1f4   : > { %v2794_v35 = vpop.f32.mrf.mxu0 }
 0x1f5   : > { %v2808_v37 = vpop.f32.mrf.mxu1  ;;  %v2795_v51 = vadd.f32 %v2794_v35, %v2461_v46 }
 0x1f7   : > { %v2809_v53 = vadd.f32 %v2808_v37, %v2795_v51 }
 0x1fc   : > { %v2796_v1 = vpop.f32.mrf.mxu0 }
 0x1fd   : > { %2891 = vmatmul.bf16.vlgmr.msrb.gmra.mxu3 %v2394_v32  ;;  %v2810_v38 = vpop.f32.mrf.mxu1  ;;  %v2797_v56 = vadd.f32 %v2796_v1, %v2461_v46 }
 0x1ff   : > { %v2811_v39 = vadd.f32 %v2810_v38, %v2797_v56 }
 0x214   : > { %v2850_v47 = vpop.f32.mrf.mxu0 }
 0x215   : > { %v2851_v10 = vadd.f32 %v2850_v47, %v2462_v49  ;;  %v2864_v9 = vpop.f32.mrf.mxu1 }
 0x217   : > { %v2865_v57 = vadd.f32 %v2864_v9, %v2851_v10 }
 0x21c   : > { %v2852_v58 = vpop.f32.mrf.mxu0 }
 0x21d   : > { %v2853_v60 = vadd.f32 %v2852_v58, %v2462_v49  ;;  %v2866_v0 = vpop.f32.mrf.mxu1 }
 0x21f   : > { %v2867_v11 = vadd.f32 %v2866_v0, %v2853_v60 }
 0x230   : > { %v2822_v36 = vpop.f32.mrf.mxu2 }
 0x231   : > { %v2823_v55 = vadd.f32 %v2822_v36, %v2809_v53 }
 0x238   : > { %v2824_v34 = vpop.f32.mrf.mxu2 }
 0x239   : > { %v2825_v62 = vadd.f32 %v2824_v34, %v2811_v39 }
 0x240   : > { %v2878_v54 = vpop.f32.mrf.mxu2 }
 0x241   : > { %v2879_v2 = vadd.f32 %v2878_v54, %v2865_v57 }
 0x248   : > { %v2880_v21 = vpop.f32.mrf.mxu2 }
 0x249   : > { %v2881_v44 = vadd.f32 %v2880_v21, %v2867_v11 }
 0x270   : > { %v2836_v43 = vpop.f32.mrf.mxu3 }
 0x271   : > { %v2837_v29 = vadd.f32 %v2836_v43, %v2823_v55 }
 0x273   : > { %v2897_v61 = vmax.f32 %v2837_v29, 0.0 }
 0x275   : > { %v2907_v3 = vmul.f32 %v2903_v31, %v2897_v61 }
 0x278   : > { %v2838_v52 = vpop.f32.mrf.mxu3 }
 0x279   : > { %v2839_v45 = vadd.f32 %v2838_v52, %v2825_v62 }
 0x27b   : > { %v2899_v15 = vmax.f32 %v2839_v45, 0.0 }
 0x27d   : > { %v2909_v48 = vmul.f32 %v2903_v31, %v2899_v15 }
 0x280   : > { %v2892_v25 = vpop.f32.mrf.mxu3 }
 0x281   : > { %v2893_v59 = vadd.f32 %v2892_v25, %v2879_v2 }
 0x283   : > { %v2898_v18 = vmax.f32 %v2893_v59, 0.0 }
 0x285   : > { %v2908_v63 = vmul.f32 %v2904_v40, %v2898_v18 }
 0x287   : > { %v2911_v5 = vadd.f32 %v2908_v63, %v2907_v3 }
 0x288   : > { %v2894_v6 = vpop.f32.mrf.mxu3 }
 0x289   : > { %v2895_v42 = vadd.f32 %v2894_v6, %v2881_v44  ;;  %2913 = vadd.xlane.f32.xlu0 %v2911_v5 }
 0x28b   : > { %v2900_v7 = vmax.f32 %v2895_v42, 0.0 }
 0x28d   : > { %v2910_v33 = vmul.f32 %v2904_v40, %v2900_v7 }
 0x28f   : > { %v2912_v8 = vadd.f32 %v2910_v33, %v2909_v48 }
 0x291   : > { %2915 = vadd.xlane.f32.xlu0 %v2912_v8 }
 0x2fc   : > { %v2914_v13 = vpop.xlane.xlu0 %2913 }
 0x2fd   : > { %v2921_v14 = vadd.f32 %v5004_v12, %v2914_v13 }
 0x2ff   : > { %v4525_v16 = vmul.f32 -1.442695, %v2921_v14 }
 0x301   : > { %5005 = vpow2.f32 %v4525_v16 }
 0x304   : > { %v2916_v17 = vpop.xlane.xlu0 %2915 }
 0x305   : > { %v2922_v20 = vadd.f32 %v5004_v12, %v2916_v17 }
 0x307   : > { %v5006_v22 = vpop.eup %5005  ;;  %v4526_v23 = vmul.f32 -1.442695, %v2922_v20 }
 0x308   : > { %v2929_v19 = vadd.f32 1.0, %v5006_v22 }
 0x309   : > { %5007 = vpow2.f32 %v4526_v23 }
 0x30a   : > { %5009 = vrcp.f32 %v2929_v19  ;;  %v2942_v30 = vand.u32 2147483648, %v2929_v19  ;;  %v2940_v35 = vand.u32 2147483647, %v2929_v19  ;;  %vm2936_vm1 = vweird.f32 %v2929_v19 }
 0x30c   : > { %v2943_v1 = vor.u32 1.1754944e-38, %v2942_v30  ;;  %vm2941_vm4 = vcmp.eq.f32.partialorder %v2940_v35, 8.507059e+37 }
 0x30f   : > { %v5008_v24 = vpop.eup %5007 }
 0x310   : > { %v5010_v26 = vpop.eup %5009  ;;  %v2930_v27 = vadd.f32 1.0, %v5008_v24 }
 0x311   : > { %v2932_v28 = vmul.f32 %v5010_v26, %v2929_v19  ;;  %vm2937_vm0 = vweird.f32 %v5010_v26 }
 0x312   : > { %5011 = vrcp.f32 %v2930_v27  ;;  %vm2938_vm3 = vmor %vm2936_vm1, %vm2937_vm0  ;;  %v2957_v38 = vand.u32 2147483648, %v2930_v27  ;;  %v2955_v51 = vand.u32 2147483647, %v2930_v27  ;;  %vm2951_vm6 = vweird.f32 %v2930_v27 }
 0x313   : > { %v2933_v4 = vsub.f32 1.0, %v2932_v28 }
 0x314   : > { %v2958_v52 = vor.u32 1.1754944e-38, %v2957_v38  ;;  %vm2956_vm8 = vcmp.eq.f32.partialorder %v2955_v51, 8.507059e+37 }
 0x315   : > { %v2934_v32 = vmul.f32 %v5010_v26, %v2933_v4 }
 0x317   : > { %v2935_v36 = vadd.f32 %v5010_v26, %v2934_v32 }
 0x318   : > { %v5012_v37 = vpop.eup %5011 }
 0x319   : > { %v2939_v41 = vsel %vm2938_vm3, %v5010_v26, %v2935_v36  ;;  %v2947_v34 = vmul.f32 %v5012_v37, %v2930_v27  ;;  %vm2952_vm5 = vweird.f32 %v5012_v37 }
 0x31a   : > { %v2944_v43 = vsel %vm2941_vm4, %v2943_v1, %v2939_v41  ;;  %vm2953_vm7 = vmor %vm2951_vm6, %vm2952_vm5 }
 0x31b   : > { %2962 = vst.msk [vmem:[%s5584_s21] sm:$0xff] %vm2961_vm2, %v2944_v43  ;;  %v2948_v46 = vsub.f32 1.0, %v2947_v34 }
 0x31d   : > { %v2949_v47 = vmul.f32 %v5012_v37, %v2948_v46 }
 0x31f   : > { %v2950_v49 = vadd.f32 %v5012_v37, %v2949_v47  ;;  %2970 = sbr.rel (!%p5351_p10) target bundleno = 843 (0x34b), region = 68 }
 0x321   : > { %v2954_v53 = vsel %vm2953_vm7, %v5012_v37, %v2950_v49 }
 0x322   : > { %v2959_v10 = vsel %vm2956_vm8, %v2958_v52, %v2954_v53 }
 0x323   : > { %2963 = vst.msk [vmem:[%s5584_s21 + $0x8] sm:$0xff] %vm2961_vm2, %v2959_v10 }
 0x324   : > { %s5662_s9 = smov (!%p2973_p8, %s2972_s9), 2 }
 0x325   : > { %s4529_s29 = sshll.u32 %s5662_s9, 3 }
 0x326   : > { %p4532_p7 = scmp.eq.s32.totalorder %s4529_s29, 0 }
 0x327   : > { %s5603_s13 = sshrl.u32 (!%p4532_p7), %s5662_s9, 1 }
 0x328   : > { %2981 = sbr.rel (%p4532_p7) target bundleno = 843 (0x34b), region = 72  ;;  %p4533_p10 = scmp.le.s32.totalorder (!%p4532_p7), %s5603_s13, 0 }
 0x32d   : > { %3150 = sbr.rel (%p4533_p10) target bundleno = 826 (0x33a), region = 154  ;;  %s5218_s6 = smov (!%p4533_p10), %s5597_s18  }
 0x32e   : > { %s5222_s19 = smov (!%p4533_p10), %s5584_s21   ;;  %s5226_s23 = smov (!%p4533_p10), 0  }
 0x32f   : > { %s5230_s24 = smov (!%p4533_p10), 0  }
 0x332 LB: >> { %v3046_v9 = vld [vmem:[%s5224_s19] sm:$0xff]  ;;  %v3048_v54 = vld [vmem:[%s5224_s19 + $0x8] sm:$0xff]  ;;  %s3050_s26 = sadd.s32 1, %s5228_s23  ;;  %s3040_s24 = sadd.s32 1, %s5232_s24   ;;  %s5232_s24 = sphi %s5230_s24, %s3040_s24   ;;  %s5228_s23 = sphi %s5226_s23, %s5227_s23   ;;  %s5224_s19 = sphi %s5222_s19, %s3055_s19   ;;  %s5220_s6 = sphi %s5218_s6, %s3056_s6  }
 0x333   : >> { %3047 = vst [vmem:[%s5220_s6] sm:$0xff] %v3046_v9  ;;  %p3051_p9 = scmp.ge.s32.totalorder %s3050_s26, %s5603_s13  ;;  %p3039_p12 = scmp.ge.s32.totalorder %s3040_s24, %s5603_s13 }
 0x334   : >> { %3049 = vst [vmem:[%s5220_s6 + $0x8] sm:$0xff] %v3048_v54 }
 0x335   : >> { %s5664_s26 = smov (%p3051_p9, %s3050_s26), 0  ;;  %3042 = sbr.rel (!%p3039_p12) target bundleno = 818 (0x332), region = 160 }
 0x336   : >> { %s4534_s20 = sshll.u32 %s5664_s26, 4  ;;  %s5227_s23 = smov %s5664_s26  }
 0x337   : >> { %s3055_s19 = scalar_lea.vmem %s5584_s21, %s4534_s20 [#allocation10]   ;;  %s3056_s6 = scalar_lea.vmem %s5597_s18, %s4534_s20  }
 0x33a PF: > { %s5613_s8 = sand.u32 1, %s5662_s9   ;;  %s4868_s12 = sshll.u32 %s5603_s13, 4 }
 0x33b   : > { %s3061_s14 = scalar_lea.vmem %s5584_s21, %s4868_s12 [#allocation10]   ;;  %s3063_s25 = scalar_lea.vmem %s5597_s18, %s4868_s12  }
 0x33c   : > { %p4539_p13 = scmp.le.s32.totalorder %s5613_s8, 0 }
 0x33d   : > { %s5234_s1 = smov (!%p4539_p13), %s3063_s25   ;;  %s5238_s11 = smov (!%p4539_p13), %s3061_s14  }
 0x33e   : > { %3164 = sbr.rel (%p4539_p13) target bundleno = 843 (0x34b), region = 165  ;;  %s5242_s22 = smov (!%p4539_p13), 0  }
 0x33f   : > { %s5246_s17 = smov (!%p4539_p13), 0  }
 0x343 LB: >> { %v3073_v55 = vld [vmem:[%s5240_s11] sm:$0xff]  ;;  %s3075_s9 = sadd.s32 1, %s5244_s22  ;;  %s3067_s17 = sadd.s32 1, %s5248_s17   ;;  %s5248_s17 = sphi %s5246_s17, %s3067_s17   ;;  %s5244_s22 = sphi %s5242_s22, %s5243_s22   ;;  %s5240_s11 = sphi %s5238_s11, %s3080_s11   ;;  %s5236_s1 = sphi %s5234_s1, %s3081_s1  }
 0x344   : >> { %3074 = vst [vmem:[%s5236_s1] sm:$0xff] %v3073_v55  ;;  %p3076_p0 = scmp.ge.s32.totalorder %s3075_s9, %s5613_s8  ;;  %p3066_p1 = scmp.ge.s32.totalorder %s3067_s17, %s5613_s8 }
 0x346   : >> { %s5666_s9 = smov (%p3076_p0, %s3075_s9), 0  ;;  %3069 = sbr.rel (!%p3066_p1) target bundleno = 835 (0x343), region = 171 }
 0x347   : >> { %s4540_s21 = sshll.u32 %s5666_s9, 3  ;;  %s5243_s22 = smov %s5666_s9  }
 0x348   : >> { %s3080_s11 = scalar_lea.vmem %s3061_s14, %s4540_s21 [#allocation10]   ;;  %s3081_s1 = scalar_lea.vmem %s3063_s25, %s4540_s21  }
 0x34b PF: > { %p21_p3 = scmp.ge.s32.totalorder %s5325_s30, 4   ;;  %s5655_s26 = smov %s5208_s27 }
 0x34c   : > { %s5656_s27 = smov %s5212_s28  ;;  %s5657_s28 = smov %s5335_s10 }
 0x34d   : > { %s5658_s29 = smov %s5325_s30  ;;  %23 = sbr.rel (!%p21_p3) target bundleno = 8 (0x8), region = 182 }
 0x352   :  { %3097 = vsyncpa [#allocation4], 1 }
 0x353   :  { %3099 = vsyncpa [#allocation4 + $0x1], 1 }
 0x354   :  { %3100 = vsyncpa [#allocation6], 1 }
 0x355   :  { %3101 = vsyncpa [#allocation9], 1 }

</bundles_post_ra>
